<compile_context>
chip_gen: v7x
topology: tpu7x:2x2x1
jax: 0.10.0
libtpu: 0.0.40
codegen_flags: <defaults>
</compile_context>

<pallas_src>
import functools

import jax
import jax.numpy as jnp
from jax import lax
from jax.experimental import pallas as pl
from jax.experimental.pallas import tpu as pltpu

# ----------------------------- model config (small synthetic CLIP-ViT) -------
CFG = dict(
    image_size=16,   # real CLIP-B/32: 224
    patch=4,         # real CLIP-B/32: 32
    channels=3,
    hidden=32,       # real: 768
    heads=4,         # real: 12
    intermediate=64, # real: 3072
    layers=2,        # real: 12
    eps=1e-5,
)

CLIP_MEAN = (0.48145466, 0.4578275, 0.40821073)
CLIP_STD = (0.26862954, 0.26130258, 0.27577711)

_VMEM_LIMIT = 32 * 1024 * 1024  # safe on v5e/v6e/v7x; raise on v6e, retune for v7x at real sizes


# ----------------------------- in-kernel helpers ------------------------------
def _ln(x, g, b, eps):
    """Row-wise layernorm in f32. x:(M,D), g,b:(1,D)."""
    mean = jnp.mean(x, axis=-1, keepdims=True)
    var = jnp.mean((x - mean) ** 2, axis=-1, keepdims=True)
    return (x - mean) * lax.rsqrt(var + eps) * g + b


# ----------------------------- Pallas kernels --------------------------------
def _embed_kernel(patch_ref, w_ref, bias_ref, g_ref, beta_ref, o_ref, *, eps):
    """Per-batch: [zero-padded cls row | patches] @ W + (cls/pos/norm-shift bias) + pre-LN.

    Row 0 of patch_ref is all zeros, row 0 of bias_ref is class_emb + pos_emb[0],
    so the class token falls out of the same matmul + LN as the patch tokens and
    the whole (1, S, D) block is written with a single lane-dense store.
    """
    p = patch_ref[0].astype(jnp.bfloat16)                        # (S, C*P*P)
    emb = jnp.dot(p, w_ref[...], preferred_element_type=jnp.float32) + bias_ref[...]
    o_ref[0] = _ln(emb, g_ref[...], beta_ref[...], eps).astype(o_ref.dtype)


def _layer_kernel(h_ref, ln1g_ref, ln1b_ref, qkvw_ref, qkvb_ref, ow_ref, ob_ref,
                  ln2g_ref, ln2b_ref, w1_ref, b1_ref, w2_ref, b2_ref,
                  o_ref, ctx_ref, *, heads, head_dim, eps):
    """Per-batch fused transformer layer (attention + MLP); residual stays in VMEM."""
    h = h_ref[0].astype(jnp.float32)                             # (S, D) f32 residual
    D = heads * head_dim

    # ---- attention: LN1 -> fused QKV (q-scale pre-folded) -> per-head attention ----
    hn = _ln(h, ln1g_ref[...], ln1b_ref[...], eps)
    qkv = jnp.dot(hn.astype(jnp.bfloat16), qkvw_ref[...],
                  preferred_element_type=jnp.float32) + qkvb_ref[...]      # (S, 3D) f32

    for hh in range(heads):
        lo = hh * head_dim
        q = qkv[:, lo:lo + head_dim].astype(jnp.bfloat16)                   # (S, Dh)
        k = qkv[:, D + lo:D + lo + head_dim].astype(jnp.bfloat16)           # (S, Dh)
        v = qkv[:, 2 * D + lo:2 * D + lo + head_dim].astype(jnp.bfloat16)   # (S, Dh)

        # q @ k^T without an explicit XLU transpose (contract last axes).
        s = lax.dot_general(q, k, (((1,), (1,)), ((), ())),
                            preferred_element_type=jnp.float32)             # (S, S) f32
        m = jnp.max(s, axis=-1, keepdims=True)
        p = jnp.exp(s - m)
        a = jnp.dot(p.astype(jnp.bfloat16), v,
                    preferred_element_type=jnp.float32)                     # (S, Dh) f32
        # Deferred softmax normalization: scale the (S, Dh) context, not the (S, S) probs.
        a = a * pl.reciprocal(jnp.sum(p, axis=-1, keepdims=True), approx=True)
        ctx_ref[:, lo:lo + head_dim] = a                                    # column block per head

    # ONE full-width out-projection (K = D keeps the MXU full) + fused residual add.
    attn = jnp.dot(ctx_ref[...].astype(jnp.bfloat16), ow_ref[...],
                   preferred_element_type=jnp.float32) + ob_ref[...]        # (S, D)
    h = h + attn

    # ---- MLP: LN2 -> fc1 + QuickGELU -> fc2 -> +residual ----
    hn2 = _ln(h, ln2g_ref[...], ln2b_ref[...], eps)
    mfc = jnp.dot(hn2.astype(jnp.bfloat16), w1_ref[...],
                  preferred_element_type=jnp.float32) + b1_ref[...]         # (S, I) f32
    mfc = mfc * jax.nn.sigmoid(1.702 * mfc)                      # QuickGELU in f32
    out = jnp.dot(mfc.astype(jnp.bfloat16), w2_ref[...],
                  preferred_element_type=jnp.float32) + b2_ref[...]         # (S, D)
    o_ref[0] = (h + out).astype(o_ref.dtype)                     # bf16 store back to HBM


def _layernorm_kernel(x_ref, g_ref, b_ref, o_ref, *, eps):
    x = x_ref[...].astype(jnp.float32)
    o_ref[...] = _ln(x, g_ref[...], b_ref[...], eps).astype(o_ref.dtype)


# ----------------------------- kernel wrappers --------------------------------
def _rep2(shape):
    """Full-array (grid-invariant) 2-D block spec."""
    return pl.BlockSpec(shape, lambda b: (0, 0))


def embed_and_preln(patches_p, w_eff, bias_full, pre_g, pre_b, eps):
    """patches_p: (B, S, C*P*P) with a zero row 0; returns bf16 (B, S, D)."""
    B, S, CPP = patches_p.shape
    D = w_eff.shape[1]
    per_b = lambda shp: pl.BlockSpec(shp, lambda b: (b, 0, 0))
    return pl.pallas_call(
        functools.partial(_embed_kernel, eps=eps),
        grid=(B,),
        in_specs=[per_b((1, S, CPP)), _rep2((CPP, D)), _rep2((S, D)),
                  _rep2((1, D)), _rep2((1, D))],
        out_specs=per_b((1, S, D)),
        out_shape=jax.ShapeDtypeStruct((B, S, D), jnp.bfloat16),
        compiler_params=pltpu.CompilerParams(
            dimension_semantics=("parallel",), vmem_limit_bytes=_VMEM_LIMIT),
    )(patches_p, w_eff, bias_full, pre_g, pre_b)


def transformer_layer(h, lyr, heads, eps):
    """One fused (attention + MLP) layer. h: bf16 (B, S, D) -> bf16 (B, S, D)."""
    B, S, D = h.shape
    I = lyr["fc1_w"].shape[1]
    Dh = D // heads
    scale = float(Dh) ** -0.5

    # Fold the q scale into the fused QKV weights/bias (free for frozen weights).
    qscale = jnp.concatenate([jnp.full((D,), scale, jnp.float32),
                              jnp.ones((2 * D,), jnp.float32)])
    qkv_w = (lyr["qkv_w"] * qscale[None, :]).astype(jnp.bfloat16)
    qkv_b = (lyr["qkv_b"] * qscale).reshape(1, 3 * D)

    per_b = pl.BlockSpec((1, S, D), lambda b: (b, 0, 0))

    flops = 2 * B * S * (D * 3 * D + D * D + 2 * D * I) + 4 * B * S * S * D
    transcendentals = B * (heads * S * S + S * I)
    bytes_accessed = (2 * B * S * D * 2                              # h in/out (bf16)
                      + (3 * D * D + D * D + 2 * D * I) * 2          # weights (bf16)
                      + (8 * D + 3 * D + I) * 4)                     # biases / LN params (f32)

    return pl.pallas_call(
        functools.partial(_layer_kernel, heads=heads, head_dim=Dh, eps=eps),
        grid=(B,),
        in_specs=[per_b,
                  _rep2((1, D)), _rep2((1, D)),
                  _rep2((D, 3 * D)), _rep2((1, 3 * D)),
                  _rep2((D, D)), _rep2((1, D)),
                  _rep2((1, D)), _rep2((1, D)),
                  _rep2((D, I)), _rep2((1, I)),
                  _rep2((I, D)), _rep2((1, D))],
        out_specs=per_b,
        out_shape=jax.ShapeDtypeStruct((B, S, D), jnp.bfloat16),
        scratch_shapes=[pltpu.VMEM((S, D), jnp.float32)],            # per-head context
        input_output_aliases={0: 0},                                 # write h in place
        compiler_params=pltpu.CompilerParams(
            dimension_semantics=("parallel",), vmem_limit_bytes=_VMEM_LIMIT),
        cost_estimate=pl.CostEstimate(flops=flops, transcendentals=transcendentals,
                                      bytes_accessed=bytes_accessed),
    )(h,
      lyr["ln1_g"].reshape(1, D), lyr["ln1_b"].reshape(1, D),
      qkv_w, qkv_b,
      lyr["o_w"].astype(jnp.bfloat16), lyr["o_b"].reshape(1, D),
      lyr["ln2_g"].reshape(1, D), lyr["ln2_b"].reshape(1, D),
      lyr["fc1_w"].astype(jnp.bfloat16), lyr["fc1_b"].reshape(1, I),
      lyr["fc2_w"].astype(jnp.bfloat16), lyr["fc2_b"].reshape(1, D))


def layernorm2d(x, g, b, eps):
    M, D = x.shape
    vmem = pl.BlockSpec(memory_space=pltpu.MemorySpace.VMEM)
    return pl.pallas_call(
        functools.partial(_layernorm_kernel, eps=eps),
        in_specs=[vmem, vmem, vmem],
        out_specs=vmem,
        out_shape=jax.ShapeDtypeStruct((M, D), jnp.float32),
    )(x, g.reshape(1, D), b.reshape(1, D))


# ----------------------------- parameter init (deterministic) ----------------
def init_params(key, cfg):
    D, I, P, C = cfg["hidden"], cfg["intermediate"], cfg["patch"], cfg["channels"]
    num_patches = (cfg["image_size"] // P) ** 2
    S = num_patches + 1

    def nrm(k, shape, scale=0.02):
        return scale * jax.random.normal(k, shape, jnp.float32)

    keys = iter(jax.random.split(key, 4 + 4 * cfg["layers"]))
    params = dict(
        patch_w=nrm(next(keys), (C * P * P, D)),      # conv(C,D,P,P), bias-free, as matmul
        class_emb=nrm(next(keys), (D,)),
        pos_emb=nrm(next(keys), (S, D)),
        pre_ln_g=jnp.ones((D,), jnp.float32),
        pre_ln_b=jnp.zeros((D,), jnp.float32),
        post_ln_g=jnp.ones((D,), jnp.float32),
        post_ln_b=jnp.zeros((D,), jnp.float32),
        layers=[],
    )
    for _ in range(cfg["layers"]):
        params["layers"].append(dict(
            ln1_g=jnp.ones((D,), jnp.float32), ln1_b=jnp.zeros((D,), jnp.float32),
            qkv_w=nrm(next(keys), (D, 3 * D)),         # fused [q | k | v] projection
            qkv_b=jnp.zeros((3 * D,), jnp.float32),
            o_w=nrm(next(keys), (D, D)), o_b=jnp.zeros((D,), jnp.float32),
            ln2_g=jnp.ones((D,), jnp.float32), ln2_b=jnp.zeros((D,), jnp.float32),
            fc1_w=nrm(next(keys), (D, I)), fc1_b=jnp.zeros((I,), jnp.float32),
            fc2_w=nrm(next(keys), (I, D)), fc2_b=jnp.zeros((D,), jnp.float32),
        ))
    return params


# ----------------------------- forward (ReferenceEncoder2.forward) -----------
def reference_encoder2_forward(params, image_nchw):
    """image_nchw: float32 in [0,1], shape (B, 3, H, W). Returns pooler_output (B, D)."""
    cfg = CFG
    B = image_nchw.shape[0]
    P, D, H = cfg["patch"], cfg["hidden"], cfg["heads"]
    C = cfg["channels"]
    Hp = cfg["image_size"] // P
    Np = Hp * Hp
    S = Np + 1
    eps = cfg["eps"]

    # --- CLIP mean/std normalization folded exactly into the patch matmul ---
    mean = jnp.asarray(CLIP_MEAN, jnp.float32)
    std = jnp.asarray(CLIP_STD, jnp.float32)
    inv_std_rows = jnp.repeat(1.0 / std, P * P)                    # (C*P*P,)
    shift_rows = jnp.repeat(mean / std, P * P)                     # (C*P*P,)
    w_eff = (params["patch_w"] * inv_std_rows[:, None]).astype(jnp.bfloat16)
    b_eff = -(shift_rows[None, :] @ params["patch_w"])             # (1, D) folded shift

    # --- raw patches (strided conv == patch-flatten + matmul), zero row 0 = class token ---
    patches = (image_nchw.reshape(B, C, Hp, P, Hp, P)
               .transpose(0, 2, 4, 1, 3, 5)                        # (B, Hp, Wp, C, P, P)
               .reshape(B, Np, C * P * P))
    patches_p = jnp.concatenate(
        [jnp.zeros((B, 1, C * P * P), patches.dtype), patches], axis=1)     # (B, S, CPP)

    # Per-row additive bias: row 0 = class_emb + pos_emb[0]; rows 1: = folded shift + pos.
    bias_full = jnp.concatenate(
        [(params["class_emb"] + params["pos_emb"][0]).reshape(1, D),
         b_eff + params["pos_emb"][1:]], axis=0)                   # (S, D) f32

    h = embed_and_preln(patches_p, w_eff, bias_full,
                        params["pre_ln_g"].reshape(1, D),
                        params["pre_ln_b"].reshape(1, D), eps)     # bf16 (B, S, D)

    # --- transformer encoder layers: ONE fused pallas_call per layer ---
    for lyr in params["layers"]:
        h = transformer_layer(h, lyr, H, eps)

    # --- pooler_output = post_layernorm(last_hidden_state[:, 0]) ---
    pooled = layernorm2d(h[:, 0, :], params["post_ln_g"], params["post_ln_b"], eps)
    return pooled


# ----------------------------- main -------------------------------------------
if __name__ == "__main__":
    key = jax.random.PRNGKey(0)
    pkey, ikey = jax.random.split(key)
    params = init_params(pkey, CFG)

    B = 2
    image = jax.random.uniform(
        ikey, (B, CFG["channels"], CFG["image_size"], CFG["image_size"]),
        dtype=jnp.float32)  # float image in [0, 1], NCHW

    # NOTE: this toy config (D=32, S=17) is for correctness only; per review, do not
    # draw perf conclusions below D=768 / S=50..257.
    fwd = jax.jit(reference_encoder2_forward)
    pooled = jax.block_until_ready(fwd(params, image))
    assert pooled.shape == (B, CFG["hidden"])
    assert bool(jnp.all(jnp.isfinite(pooled)))
    print("KERNEL_OK")
</pallas_src>

<mosaic_0001>
module attributes {stable_mosaic.version = 11 : i64} {
  func.func @_layernorm_kernel(%arg0: memref<2x32xbf16, #tpu.memory_space<vmem>>, %arg1: memref<1x32xf32, #tpu.memory_space<vmem>>, %arg2: memref<1x32xf32, #tpu.memory_space<vmem>>, %arg3: memref<2x32xf32, #tpu.memory_space<vmem>>) attributes {dimension_semantics = [], scalar_prefetch = 0 : i64, scratch_operands = 0 : i64, tpu.core_type = #tpu.core_type<tc>} {
    %c0 = arith.constant 0 : index
    %c0_0 = arith.constant 0 : index
    %0 = vector.load %arg0[%c0, %c0_0] : memref<2x32xbf16, #tpu.memory_space<vmem>>, vector<2x32xbf16>
    %1 = arith.extf %0 : vector<2x32xbf16> to vector<2x32xf32>
    %c0_1 = arith.constant 0 : index
    %c0_2 = arith.constant 0 : index
    %2 = vector.load %arg1[%c0_1, %c0_2] : memref<1x32xf32, #tpu.memory_space<vmem>>, vector<1x32xf32>
    %c0_3 = arith.constant 0 : index
    %c0_4 = arith.constant 0 : index
    %3 = vector.load %arg2[%c0_3, %c0_4] : memref<1x32xf32, #tpu.memory_space<vmem>>, vector<1x32xf32>
    %cst = arith.constant dense<0.000000e+00> : vector<2xf32>
    %4 = vector.multi_reduction <add>, %1, %cst [1] : vector<2x32xf32> to vector<2xf32>
    %5 = vector.shape_cast %4 : vector<2xf32> to vector<2x1xf32>
    %cst_5 = arith.constant 3.200000e+01 : f32
    %6 = vector.broadcast %cst_5 : f32 to vector<2x1xf32>
    %7 = arith.divf %5, %6 : vector<2x1xf32>
    %8 = vector.broadcast %7 : vector<2x1xf32> to vector<2x32xf32>
    %9 = arith.subf %1, %8 : vector<2x32xf32>
    %10 = arith.mulf %9, %9 : vector<2x32xf32>
    %cst_6 = arith.constant dense<0.000000e+00> : vector<2xf32>
    %11 = vector.multi_reduction <add>, %10, %cst_6 [1] : vector<2x32xf32> to vector<2xf32>
    %12 = vector.shape_cast %11 : vector<2xf32> to vector<2x1xf32>
    %cst_7 = arith.constant 3.200000e+01 : f32
    %13 = vector.broadcast %cst_7 : f32 to vector<2x1xf32>
    %14 = arith.divf %12, %13 : vector<2x1xf32>
    %15 = vector.broadcast %7 : vector<2x1xf32> to vector<2x32xf32>
    %16 = arith.subf %1, %15 : vector<2x32xf32>
    %cst_8 = arith.constant 9.99999974E-6 : f32
    %17 = vector.broadcast %cst_8 : f32 to vector<2x1xf32>
    %18 = arith.addf %14, %17 : vector<2x1xf32>
    %19 = math.rsqrt %18 : vector<2x1xf32>
    %20 = vector.broadcast %19 : vector<2x1xf32> to vector<2x32xf32>
    %21 = arith.mulf %16, %20 : vector<2x32xf32>
    %22 = vector.broadcast %2 : vector<1x32xf32> to vector<2x32xf32>
    %23 = arith.mulf %21, %22 : vector<2x32xf32>
    %24 = vector.broadcast %3 : vector<1x32xf32> to vector<2x32xf32>
    %25 = arith.addf %23, %24 : vector<2x32xf32>
    %c0_9 = arith.constant 0 : index
    %c0_10 = arith.constant 0 : index
    %26 = vector.load %arg3[%c0_9, %c0_10] : memref<2x32xf32, #tpu.memory_space<vmem>>, vector<2x32xf32>
    tpu.vector_store %arg3[%c0_9, %c0_10], %25 {strides = array<i32>} : memref<2x32xf32, #tpu.memory_space<vmem>>, vector<2x32xf32>,
    return
  }
}

module attributes {stable_mosaic.version = 11 : i64} {
  func.func @_embed_kernel(%arg0: i32, %arg1: memref<1x17x48xf32, #tpu.memory_space<vmem>>, %arg2: memref<48x32xbf16, #tpu.memory_space<vmem>>, %arg3: memref<17x32xf32, #tpu.memory_space<vmem>>, %arg4: memref<1x32xf32, #tpu.memory_space<vmem>>, %arg5: memref<1x32xf32, #tpu.memory_space<vmem>>, %arg6: memref<1x17x32xbf16, #tpu.memory_space<vmem>>) attributes {dimension_semantics = [#tpu.dimension_semantics<parallel>], iteration_bounds = array<i64: 2>, scalar_prefetch = 0 : i64, scratch_operands = 0 : i64, tpu.core_type = #tpu.core_type<tc>, window_params = [{transform_indices = @transform_0, window_bounds = array<i64: 1, 17, 48>}, {pipeline_mode = #tpu.pipeline_mode<synchronous>, transform_indices = @transform_1, window_bounds = array<i64: 48, 32>}, {pipeline_mode = #tpu.pipeline_mode<synchronous>, transform_indices = @transform_2, window_bounds = array<i64: 17, 32>}, {pipeline_mode = #tpu.pipeline_mode<synchronous>, transform_indices = @transform_3, window_bounds = array<i64: 1, 32>}, {pipeline_mode = #tpu.pipeline_mode<synchronous>, transform_indices = @transform_4, window_bounds = array<i64: 1, 32>}, {transform_indices = @transform_5, window_bounds = array<i64: 1, 17, 32>}]} {
    %c0 = arith.constant 0 : index
    %c0_0 = arith.constant 0 : index
    %c0_1 = arith.constant 0 : index
    %0 = vector.load %arg1[%c0, %c0_0, %c0_1] : memref<1x17x48xf32, #tpu.memory_space<vmem>>, vector<1x17x48xf32>
    %1 = vector.shape_cast %0 : vector<1x17x48xf32> to vector<17x48xf32>
    %2 = arith.truncf %1 : vector<17x48xf32> to vector<17x48xbf16>
    %c0_2 = arith.constant 0 : index
    %c0_3 = arith.constant 0 : index
    %3 = vector.load %arg2[%c0_2, %c0_3] : memref<48x32xbf16, #tpu.memory_space<vmem>>, vector<48x32xbf16>
    %cst = arith.constant dense<0.000000e+00> : vector<17x32xf32>
    %4 = tpu.matmul %2, %3, %cst {dimension_numbers = #tpu.dot_dimension_numbers<[1], [0], [0], [1], [0, 0, 1, 1], [], []>} : vector<17x48xbf16>, vector<48x32xbf16>, vector<17x32xf32> -> vector<17x32xf32>
    %c0_4 = arith.constant 0 : index
    %c0_5 = arith.constant 0 : index
    %5 = vector.load %arg3[%c0_4, %c0_5] : memref<17x32xf32, #tpu.memory_space<vmem>>, vector<17x32xf32>
    %6 = arith.addf %4, %5 : vector<17x32xf32>
    %c0_6 = arith.constant 0 : index
    %c0_7 = arith.constant 0 : index
    %7 = vector.load %arg4[%c0_6, %c0_7] : memref<1x32xf32, #tpu.memory_space<vmem>>, vector<1x32xf32>
    %c0_8 = arith.constant 0 : index
    %c0_9 = arith.constant 0 : index
    %8 = vector.load %arg5[%c0_8, %c0_9] : memref<1x32xf32, #tpu.memory_space<vmem>>, vector<1x32xf32>
    %cst_10 = arith.constant dense<0.000000e+00> : vector<17xf32>
    %9 = vector.multi_reduction <add>, %6, %cst_10 [1] : vector<17x32xf32> to vector<17xf32>
    %10 = vector.shape_cast %9 : vector<17xf32> to vector<17x1xf32>
    %cst_11 = arith.constant 3.200000e+01 : f32
    %11 = vector.broadcast %cst_11 : f32 to vector<17x1xf32>
    %12 = arith.divf %10, %11 : vector<17x1xf32>
    %13 = vector.broadcast %12 : vector<17x1xf32> to vector<17x32xf32>
    %14 = arith.subf %6, %13 : vector<17x32xf32>
    %15 = arith.mulf %14, %14 : vector<17x32xf32>
    %cst_12 = arith.constant dense<0.000000e+00> : vector<17xf32>
    %16 = vector.multi_reduction <add>, %15, %cst_12 [1] : vector<17x32xf32> to vector<17xf32>
    %17 = vector.shape_cast %16 : vector<17xf32> to vector<17x1xf32>
    %cst_13 = arith.constant 3.200000e+01 : f32
    %18 = vector.broadcast %cst_13 : f32 to vector<17x1xf32>
    %19 = arith.divf %17, %18 : vector<17x1xf32>
    %20 = vector.broadcast %12 : vector<17x1xf32> to vector<17x32xf32>
    %21 = arith.subf %6, %20 : vector<17x32xf32>
    %cst_14 = arith.constant 9.99999974E-6 : f32
    %22 = vector.broadcast %cst_14 : f32 to vector<17x1xf32>
    %23 = arith.addf %19, %22 : vector<17x1xf32>
    %24 = math.rsqrt %23 : vector<17x1xf32>
    %25 = vector.broadcast %24 : vector<17x1xf32> to vector<17x32xf32>
    %26 = arith.mulf %21, %25 : vector<17x32xf32>
    %27 = vector.broadcast %7 : vector<1x32xf32> to vector<17x32xf32>
    %28 = arith.mulf %26, %27 : vector<17x32xf32>
    %29 = vector.broadcast %8 : vector<1x32xf32> to vector<17x32xf32>
    %30 = arith.addf %28, %29 : vector<17x32xf32>
    %31 = arith.truncf %30 : vector<17x32xf32> to vector<17x32xbf16>
    %c0_15 = arith.constant 0 : index
    %c0_16 = arith.constant 0 : index
    %c0_17 = arith.constant 0 : index
    %32 = vector.load %arg6[%c0_15, %c0_16, %c0_17] : memref<1x17x32xbf16, #tpu.memory_space<vmem>>, vector<1x17x32xbf16>
    %33 = vector.shape_cast %32 : vector<1x17x32xbf16> to vector<17x32xbf16>
    %34 = vector.shape_cast %31 : vector<17x32xbf16> to vector<1x17x32xbf16>
    tpu.vector_store %arg6[%c0_15, %c0_16, %c0_17], %34 {strides = array<i32>} : memref<1x17x32xbf16, #tpu.memory_space<vmem>>, vector<1x17x32xbf16>,
    return
  }
  func.func @transform_0(%arg0: i32) -> (i32, i32, i32) {
    %c0_i32 = arith.constant 0 : i32
    %c0_i32_0 = arith.constant 0 : i32
    %c0_i32_1 = arith.constant 0 : i32
    return %arg0, %c0_i32, %c0_i32_0 : i32, i32, i32
  }
  func.func @transform_1(%arg0: i32) -> (i32, i32) {
    %c0_i32 = arith.constant 0 : i32
    %c0_i32_0 = arith.constant 0 : i32
    %c0_i32_1 = arith.constant 0 : i32
    return %c0_i32, %c0_i32_0 : i32, i32
  }
  func.func @transform_2(%arg0: i32) -> (i32, i32) {
    %c0_i32 = arith.constant 0 : i32
    %c0_i32_0 = arith.constant 0 : i32
    %c0_i32_1 = arith.constant 0 : i32
    return %c0_i32, %c0_i32_0 : i32, i32
  }
  func.func @transform_3(%arg0: i32) -> (i32, i32) {
    %c0_i32 = arith.constant 0 : i32
    %c0_i32_0 = arith.constant 0 : i32
    %c0_i32_1 = arith.constant 0 : i32
    return %c0_i32, %c0_i32_0 : i32, i32
  }
  func.func @transform_4(%arg0: i32) -> (i32, i32) {
    %c0_i32 = arith.constant 0 : i32
    %c0_i32_0 = arith.constant 0 : i32
    %c0_i32_1 = arith.constant 0 : i32
    return %c0_i32, %c0_i32_0 : i32, i32
  }
  func.func @transform_5(%arg0: i32) -> (i32, i32, i32) {
    %c0_i32 = arith.constant 0 : i32
    %c0_i32_0 = arith.constant 0 : i32
    %c0_i32_1 = arith.constant 0 : i32
    return %arg0, %c0_i32, %c0_i32_0 : i32, i32, i32
  }
}

module attributes {stable_mosaic.version = 11 : i64} {
  func.func @_layer_kernel(%arg0: i32, %arg1: memref<1x17x32xbf16, #tpu.memory_space<vmem>>, %arg2: memref<1x32xf32, #tpu.memory_space<vmem>>, %arg3: memref<1x32xf32, #tpu.memory_space<vmem>>, %arg4: memref<32x96xbf16, #tpu.memory_space<vmem>>, %arg5: memref<1x96xf32, #tpu.memory_space<vmem>>, %arg6: memref<32x32xbf16, #tpu.memory_space<vmem>>, %arg7: memref<1x32xf32, #tpu.memory_space<vmem>>, %arg8: memref<1x32xf32, #tpu.memory_space<vmem>>, %arg9: memref<1x32xf32, #tpu.memory_space<vmem>>, %arg10: memref<32x64xbf16, #tpu.memory_space<vmem>>, %arg11: memref<1x64xf32, #tpu.memory_space<vmem>>, %arg12: memref<64x32xbf16, #tpu.memory_space<vmem>>, %arg13: memref<1x32xf32, #tpu.memory_space<vmem>>, %arg14: memref<1x17x32xbf16, #tpu.memory_space<vmem>>, %arg15: memref<17x32xf32, #tpu.memory_space<vmem>>) attributes {dimension_semantics = [#tpu.dimension_semantics<parallel>], iteration_bounds = array<i64: 2>, scalar_prefetch = 0 : i64, scratch_operands = 1 : i64, tpu.core_type = #tpu.core_type<tc>, window_params = [{transform_indices = @transform_0, window_bounds = array<i64: 1, 17, 32>}, {pipeline_mode = #tpu.pipeline_mode<synchronous>, transform_indices = @transform_1, window_bounds = array<i64: 1, 32>}, {pipeline_mode = #tpu.pipeline_mode<synchronous>, transform_indices = @transform_2, window_bounds = array<i64: 1, 32>}, {pipeline_mode = #tpu.pipeline_mode<synchronous>, transform_indices = @transform_3, window_bounds = array<i64: 32, 96>}, {pipeline_mode = #tpu.pipeline_mode<synchronous>, transform_indices = @transform_4, window_bounds = array<i64: 1, 96>}, {pipeline_mode = #tpu.pipeline_mode<synchronous>, transform_indices = @transform_5, window_bounds = array<i64: 32, 32>}, {pipeline_mode = #tpu.pipeline_mode<synchronous>, transform_indices = @transform_6, window_bounds = array<i64: 1, 32>}, {pipeline_mode = #tpu.pipeline_mode<synchronous>, transform_indices = @transform_7, window_bounds = array<i64: 1, 32>}, {pipeline_mode = #tpu.pipeline_mode<synchronous>, transform_indices = @transform_8, window_bounds = array<i64: 1, 32>}, {pipeline_mode = #tpu.pipeline_mode<synchronous>, transform_indices = @transform_9, window_bounds = array<i64: 32, 64>}, {pipeline_mode = #tpu.pipeline_mode<synchronous>, transform_indices = @transform_10, window_bounds = array<i64: 1, 64>}, {pipeline_mode = #tpu.pipeline_mode<synchronous>, transform_indices = @transform_11, window_bounds = array<i64: 64, 32>}, {pipeline_mode = #tpu.pipeline_mode<synchronous>, transform_indices = @transform_12, window_bounds = array<i64: 1, 32>}, {transform_indices = @transform_13, window_bounds = array<i64: 1, 17, 32>}]} {
    %c0 = arith.constant 0 : index
    %c0_0 = arith.constant 0 : index
    %c0_1 = arith.constant 0 : index
    %0 = vector.load %arg1[%c0, %c0_0, %c0_1] : memref<1x17x32xbf16, #tpu.memory_space<vmem>>, vector<1x17x32xbf16>
    %1 = vector.shape_cast %0 : vector<1x17x32xbf16> to vector<17x32xbf16>
    %2 = arith.extf %1 : vector<17x32xbf16> to vector<17x32xf32>
    %c0_2 = arith.constant 0 : index
    %c0_3 = arith.constant 0 : index
    %3 = vector.load %arg2[%c0_2, %c0_3] : memref<1x32xf32, #tpu.memory_space<vmem>>, vector<1x32xf32>
    %c0_4 = arith.constant 0 : index
    %c0_5 = arith.constant 0 : index
    %4 = vector.load %arg3[%c0_4, %c0_5] : memref<1x32xf32, #tpu.memory_space<vmem>>, vector<1x32xf32>
    %cst = arith.constant dense<0.000000e+00> : vector<17xf32>
    %5 = vector.multi_reduction <add>, %2, %cst [1] : vector<17x32xf32> to vector<17xf32>
    %6 = vector.shape_cast %5 : vector<17xf32> to vector<17x1xf32>
    %cst_6 = arith.constant 3.200000e+01 : f32
    %7 = vector.broadcast %cst_6 : f32 to vector<17x1xf32>
    %8 = arith.divf %6, %7 : vector<17x1xf32>
    %9 = vector.broadcast %8 : vector<17x1xf32> to vector<17x32xf32>
    %10 = arith.subf %2, %9 : vector<17x32xf32>
    %11 = arith.mulf %10, %10 : vector<17x32xf32>
    %cst_7 = arith.constant dense<0.000000e+00> : vector<17xf32>
    %12 = vector.multi_reduction <add>, %11, %cst_7 [1] : vector<17x32xf32> to vector<17xf32>
    %13 = vector.shape_cast %12 : vector<17xf32> to vector<17x1xf32>
    %cst_8 = arith.constant 3.200000e+01 : f32
    %14 = vector.broadcast %cst_8 : f32 to vector<17x1xf32>
    %15 = arith.divf %13, %14 : vector<17x1xf32>
    %16 = vector.broadcast %8 : vector<17x1xf32> to vector<17x32xf32>
    %17 = arith.subf %2, %16 : vector<17x32xf32>
    %cst_9 = arith.constant 9.99999974E-6 : f32
    %18 = vector.broadcast %cst_9 : f32 to vector<17x1xf32>
    %19 = arith.addf %15, %18 : vector<17x1xf32>
    %20 = math.rsqrt %19 : vector<17x1xf32>
    %21 = vector.broadcast %20 : vector<17x1xf32> to vector<17x32xf32>
    %22 = arith.mulf %17, %21 : vector<17x32xf32>
    %23 = vector.broadcast %3 : vector<1x32xf32> to vector<17x32xf32>
    %24 = arith.mulf %22, %23 : vector<17x32xf32>
    %25 = vector.broadcast %4 : vector<1x32xf32> to vector<17x32xf32>
    %26 = arith.addf %24, %25 : vector<17x32xf32>
    %27 = arith.truncf %26 : vector<17x32xf32> to vector<17x32xbf16>
    %c0_10 = arith.constant 0 : index
    %c0_11 = arith.constant 0 : index
    %28 = vector.load %arg4[%c0_10, %c0_11] : memref<32x96xbf16, #tpu.memory_space<vmem>>, vector<32x96xbf16>
    %cst_12 = arith.constant dense<0.000000e+00> : vector<17x96xf32>
    %29 = tpu.matmul %27, %28, %cst_12 {dimension_numbers = #tpu.dot_dimension_numbers<[1], [0], [0], [1], [0, 0, 1, 1], [], []>} : vector<17x32xbf16>, vector<32x96xbf16>, vector<17x96xf32> -> vector<17x96xf32>
    %c0_13 = arith.constant 0 : index
    %c0_14 = arith.constant 0 : index
    %30 = vector.load %arg5[%c0_13, %c0_14] : memref<1x96xf32, #tpu.memory_space<vmem>>, vector<1x96xf32>
    %31 = vector.broadcast %30 : vector<1x96xf32> to vector<17x96xf32>
    %32 = arith.addf %29, %31 : vector<17x96xf32>
    %33 = vector.extract_strided_slice %32 {offsets = [0, 0], sizes = [17, 8], strides = [1, 1]} : vector<17x96xf32> to vector<17x8xf32>
    %34 = arith.truncf %33 : vector<17x8xf32> to vector<17x8xbf16>
    %35 = vector.extract_strided_slice %32 {offsets = [0, 32], sizes = [17, 8], strides = [1, 1]} : vector<17x96xf32> to vector<17x8xf32>
    %36 = arith.truncf %35 : vector<17x8xf32> to vector<17x8xbf16>
    %37 = vector.extract_strided_slice %32 {offsets = [0, 64], sizes = [17, 8], strides = [1, 1]} : vector<17x96xf32> to vector<17x8xf32>
    %38 = arith.truncf %37 : vector<17x8xf32> to vector<17x8xbf16>
    %cst_15 = arith.constant dense<0.000000e+00> : vector<17x17xf32>
    %39 = tpu.matmul %34, %36, %cst_15 {dimension_numbers = #tpu.dot_dimension_numbers<[1], [1], [0], [0], [0, 0, 1, 0], [], []>} : vector<17x8xbf16>, vector<17x8xbf16>, vector<17x17xf32> -> vector<17x17xf32>
    %cst_16 = arith.constant dense<0xFF800000> : vector<17xf32>
    %40 = vector.multi_reduction <maximumf>, %39, %cst_16 [1] : vector<17x17xf32> to vector<17xf32>
    %41 = vector.shape_cast %40 : vector<17xf32> to vector<17x1xf32>
    %42 = vector.broadcast %41 : vector<17x1xf32> to vector<17x17xf32>
    %43 = arith.subf %39, %42 : vector<17x17xf32>
    %44 = math.exp %43 : vector<17x17xf32>
    %45 = arith.truncf %44 : vector<17x17xf32> to vector<17x17xbf16>
    %cst_17 = arith.constant dense<0.000000e+00> : vector<17x8xf32>
    %46 = tpu.matmul %45, %38, %cst_17 {dimension_numbers = #tpu.dot_dimension_numbers<[1], [0], [0], [1], [0, 0, 1, 1], [], []>} : vector<17x17xbf16>, vector<17x8xbf16>, vector<17x8xf32> -> vector<17x8xf32>
    %cst_18 = arith.constant dense<0.000000e+00> : vector<17xf32>
    %47 = vector.multi_reduction <add>, %44, %cst_18 [1] : vector<17x17xf32> to vector<17xf32>
    %48 = vector.shape_cast %47 : vector<17xf32> to vector<17x1xf32>
    %49 = tpu.reciprocal %48 {approx = true} : vector<17x1xf32> -> vector<17x1xf32>
    %50 = vector.broadcast %49 : vector<17x1xf32> to vector<17x8xf32>
    %51 = arith.mulf %46, %50 : vector<17x8xf32>
    %c0_19 = arith.constant 0 : index
    %c0_20 = arith.constant 0 : index
    %52 = vector.load %arg15[%c0_19, %c0_20] : memref<17x32xf32, #tpu.memory_space<vmem>>, vector<17x8xf32>
    tpu.vector_store %arg15[%c0_19, %c0_20], %51 {strides = array<i32>} : memref<17x32xf32, #tpu.memory_space<vmem>>, vector<17x8xf32>,
    %53 = vector.extract_strided_slice %32 {offsets = [0, 8], sizes = [17, 8], strides = [1, 1]} : vector<17x96xf32> to vector<17x8xf32>
    %54 = arith.truncf %53 : vector<17x8xf32> to vector<17x8xbf16>
    %55 = vector.extract_strided_slice %32 {offsets = [0, 40], sizes = [17, 8], strides = [1, 1]} : vector<17x96xf32> to vector<17x8xf32>
    %56 = arith.truncf %55 : vector<17x8xf32> to vector<17x8xbf16>
    %57 = vector.extract_strided_slice %32 {offsets = [0, 72], sizes = [17, 8], strides = [1, 1]} : vector<17x96xf32> to vector<17x8xf32>
    %58 = arith.truncf %57 : vector<17x8xf32> to vector<17x8xbf16>
    %cst_21 = arith.constant dense<0.000000e+00> : vector<17x17xf32>
    %59 = tpu.matmul %54, %56, %cst_21 {dimension_numbers = #tpu.dot_dimension_numbers<[1], [1], [0], [0], [0, 0, 1, 0], [], []>} : vector<17x8xbf16>, vector<17x8xbf16>, vector<17x17xf32> -> vector<17x17xf32>
    %cst_22 = arith.constant dense<0xFF800000> : vector<17xf32>
    %60 = vector.multi_reduction <maximumf>, %59, %cst_22 [1] : vector<17x17xf32> to vector<17xf32>
    %61 = vector.shape_cast %60 : vector<17xf32> to vector<17x1xf32>
    %62 = vector.broadcast %61 : vector<17x1xf32> to vector<17x17xf32>
    %63 = arith.subf %59, %62 : vector<17x17xf32>
    %64 = math.exp %63 : vector<17x17xf32>
    %65 = arith.truncf %64 : vector<17x17xf32> to vector<17x17xbf16>
    %cst_23 = arith.constant dense<0.000000e+00> : vector<17x8xf32>
    %66 = tpu.matmul %65, %58, %cst_23 {dimension_numbers = #tpu.dot_dimension_numbers<[1], [0], [0], [1], [0, 0, 1, 1], [], []>} : vector<17x17xbf16>, vector<17x8xbf16>, vector<17x8xf32> -> vector<17x8xf32>
    %cst_24 = arith.constant dense<0.000000e+00> : vector<17xf32>
    %67 = vector.multi_reduction <add>, %64, %cst_24 [1] : vector<17x17xf32> to vector<17xf32>
    %68 = vector.shape_cast %67 : vector<17xf32> to vector<17x1xf32>
    %69 = tpu.reciprocal %68 {approx = true} : vector<17x1xf32> -> vector<17x1xf32>
    %70 = vector.broadcast %69 : vector<17x1xf32> to vector<17x8xf32>
    %71 = arith.mulf %66, %70 : vector<17x8xf32>
    %c0_25 = arith.constant 0 : index
    %c8 = arith.constant 8 : index
    %72 = vector.load %arg15[%c0_25, %c8] : memref<17x32xf32, #tpu.memory_space<vmem>>, vector<17x8xf32>
    tpu.vector_store %arg15[%c0_25, %c8], %71 {strides = array<i32>} : memref<17x32xf32, #tpu.memory_space<vmem>>, vector<17x8xf32>,
    %73 = vector.extract_strided_slice %32 {offsets = [0, 16], sizes = [17, 8], strides = [1, 1]} : vector<17x96xf32> to vector<17x8xf32>
    %74 = arith.truncf %73 : vector<17x8xf32> to vector<17x8xbf16>
    %75 = vector.extract_strided_slice %32 {offsets = [0, 48], sizes = [17, 8], strides = [1, 1]} : vector<17x96xf32> to vector<17x8xf32>
    %76 = arith.truncf %75 : vector<17x8xf32> to vector<17x8xbf16>
    %77 = vector.extract_strided_slice %32 {offsets = [0, 80], sizes = [17, 8], strides = [1, 1]} : vector<17x96xf32> to vector<17x8xf32>
    %78 = arith.truncf %77 : vector<17x8xf32> to vector<17x8xbf16>
    %cst_26 = arith.constant dense<0.000000e+00> : vector<17x17xf32>
    %79 = tpu.matmul %74, %76, %cst_26 {dimension_numbers = #tpu.dot_dimension_numbers<[1], [1], [0], [0], [0, 0, 1, 0], [], []>} : vector<17x8xbf16>, vector<17x8xbf16>, vector<17x17xf32> -> vector<17x17xf32>
    %cst_27 = arith.constant dense<0xFF800000> : vector<17xf32>
    %80 = vector.multi_reduction <maximumf>, %79, %cst_27 [1] : vector<17x17xf32> to vector<17xf32>
    %81 = vector.shape_cast %80 : vector<17xf32> to vector<17x1xf32>
    %82 = vector.broadcast %81 : vector<17x1xf32> to vector<17x17xf32>
    %83 = arith.subf %79, %82 : vector<17x17xf32>
    %84 = math.exp %83 : vector<17x17xf32>
    %85 = arith.truncf %84 : vector<17x17xf32> to vector<17x17xbf16>
    %cst_28 = arith.constant dense<0.000000e+00> : vector<17x8xf32>
    %86 = tpu.matmul %85, %78, %cst_28 {dimension_numbers = #tpu.dot_dimension_numbers<[1], [0], [0], [1], [0, 0, 1, 1], [], []>} : vector<17x17xbf16>, vector<17x8xbf16>, vector<17x8xf32> -> vector<17x8xf32>
    %cst_29 = arith.constant dense<0.000000e+00> : vector<17xf32>
    %87 = vector.multi_reduction <add>, %84, %cst_29 [1] : vector<17x17xf32> to vector<17xf32>
    %88 = vector.shape_cast %87 : vector<17xf32> to vector<17x1xf32>
    %89 = tpu.reciprocal %88 {approx = true} : vector<17x1xf32> -> vector<17x1xf32>
    %90 = vector.broadcast %89 : vector<17x1xf32> to vector<17x8xf32>
    %91 = arith.mulf %86, %90 : vector<17x8xf32>
    %c0_30 = arith.constant 0 : index
    %c16 = arith.constant 16 : index
    %92 = vector.load %arg15[%c0_30, %c16] : memref<17x32xf32, #tpu.memory_space<vmem>>, vector<17x8xf32>
    tpu.vector_store %arg15[%c0_30, %c16], %91 {strides = array<i32>} : memref<17x32xf32, #tpu.memory_space<vmem>>, vector<17x8xf32>,
    %93 = vector.extract_strided_slice %32 {offsets = [0, 24], sizes = [17, 8], strides = [1, 1]} : vector<17x96xf32> to vector<17x8xf32>
    %94 = arith.truncf %93 : vector<17x8xf32> to vector<17x8xbf16>
    %95 = vector.extract_strided_slice %32 {offsets = [0, 56], sizes = [17, 8], strides = [1, 1]} : vector<17x96xf32> to vector<17x8xf32>
    %96 = arith.truncf %95 : vector<17x8xf32> to vector<17x8xbf16>
    %97 = vector.extract_strided_slice %32 {offsets = [0, 88], sizes = [17, 8], strides = [1, 1]} : vector<17x96xf32> to vector<17x8xf32>
    %98 = arith.truncf %97 : vector<17x8xf32> to vector<17x8xbf16>
    %cst_31 = arith.constant dense<0.000000e+00> : vector<17x17xf32>
    %99 = tpu.matmul %94, %96, %cst_31 {dimension_numbers = #tpu.dot_dimension_numbers<[1], [1], [0], [0], [0, 0, 1, 0], [], []>} : vector<17x8xbf16>, vector<17x8xbf16>, vector<17x17xf32> -> vector<17x17xf32>
    %cst_32 = arith.constant dense<0xFF800000> : vector<17xf32>
    %100 = vector.multi_reduction <maximumf>, %99, %cst_32 [1] : vector<17x17xf32> to vector<17xf32>
    %101 = vector.shape_cast %100 : vector<17xf32> to vector<17x1xf32>
    %102 = vector.broadcast %101 : vector<17x1xf32> to vector<17x17xf32>
    %103 = arith.subf %99, %102 : vector<17x17xf32>
    %104 = math.exp %103 : vector<17x17xf32>
    %105 = arith.truncf %104 : vector<17x17xf32> to vector<17x17xbf16>
    %cst_33 = arith.constant dense<0.000000e+00> : vector<17x8xf32>
    %106 = tpu.matmul %105, %98, %cst_33 {dimension_numbers = #tpu.dot_dimension_numbers<[1], [0], [0], [1], [0, 0, 1, 1], [], []>} : vector<17x17xbf16>, vector<17x8xbf16>, vector<17x8xf32> -> vector<17x8xf32>
    %cst_34 = arith.constant dense<0.000000e+00> : vector<17xf32>
    %107 = vector.multi_reduction <add>, %104, %cst_34 [1] : vector<17x17xf32> to vector<17xf32>
    %108 = vector.shape_cast %107 : vector<17xf32> to vector<17x1xf32>
    %109 = tpu.reciprocal %108 {approx = true} : vector<17x1xf32> -> vector<17x1xf32>
    %110 = vector.broadcast %109 : vector<17x1xf32> to vector<17x8xf32>
    %111 = arith.mulf %106, %110 : vector<17x8xf32>
    %c0_35 = arith.constant 0 : index
    %c24 = arith.constant 24 : index
    %112 = vector.load %arg15[%c0_35, %c24] : memref<17x32xf32, #tpu.memory_space<vmem>>, vector<17x8xf32>
    tpu.vector_store %arg15[%c0_35, %c24], %111 {strides = array<i32>} : memref<17x32xf32, #tpu.memory_space<vmem>>, vector<17x8xf32>,
    %c0_36 = arith.constant 0 : index
    %c0_37 = arith.constant 0 : index
    %113 = vector.load %arg15[%c0_36, %c0_37] : memref<17x32xf32, #tpu.memory_space<vmem>>, vector<17x32xf32>
    %114 = arith.truncf %113 : vector<17x32xf32> to vector<17x32xbf16>
    %c0_38 = arith.constant 0 : index
    %c0_39 = arith.constant 0 : index
    %115 = vector.load %arg6[%c0_38, %c0_39] : memref<32x32xbf16, #tpu.memory_space<vmem>>, vector<32x32xbf16>
    %cst_40 = arith.constant dense<0.000000e+00> : vector<17x32xf32>
    %116 = tpu.matmul %114, %115, %cst_40 {dimension_numbers = #tpu.dot_dimension_numbers<[1], [0], [0], [1], [0, 0, 1, 1], [], []>} : vector<17x32xbf16>, vector<32x32xbf16>, vector<17x32xf32> -> vector<17x32xf32>
    %c0_41 = arith.constant 0 : index
    %c0_42 = arith.constant 0 : index
    %117 = vector.load %arg7[%c0_41, %c0_42] : memref<1x32xf32, #tpu.memory_space<vmem>>, vector<1x32xf32>
    %118 = vector.broadcast %117 : vector<1x32xf32> to vector<17x32xf32>
    %119 = arith.addf %116, %118 : vector<17x32xf32>
    %120 = arith.addf %2, %119 : vector<17x32xf32>
    %c0_43 = arith.constant 0 : index
    %c0_44 = arith.constant 0 : index
    %121 = vector.load %arg8[%c0_43, %c0_44] : memref<1x32xf32, #tpu.memory_space<vmem>>, vector<1x32xf32>
    %c0_45 = arith.constant 0 : index
    %c0_46 = arith.constant 0 : index
    %122 = vector.load %arg9[%c0_45, %c0_46] : memref<1x32xf32, #tpu.memory_space<vmem>>, vector<1x32xf32>
    %cst_47 = arith.constant dense<0.000000e+00> : vector<17xf32>
    %123 = vector.multi_reduction <add>, %120, %cst_47 [1] : vector<17x32xf32> to vector<17xf32>
    %124 = vector.shape_cast %123 : vector<17xf32> to vector<17x1xf32>
    %cst_48 = arith.constant 3.200000e+01 : f32
    %125 = vector.broadcast %cst_48 : f32 to vector<17x1xf32>
    %126 = arith.divf %124, %125 : vector<17x1xf32>
    %127 = vector.broadcast %126 : vector<17x1xf32> to vector<17x32xf32>
    %128 = arith.subf %120, %127 : vector<17x32xf32>
    %129 = arith.mulf %128, %128 : vector<17x32xf32>
    %cst_49 = arith.constant dense<0.000000e+00> : vector<17xf32>
    %130 = vector.multi_reduction <add>, %129, %cst_49 [1] : vector<17x32xf32> to vector<17xf32>
    %131 = vector.shape_cast %130 : vector<17xf32> to vector<17x1xf32>
    %cst_50 = arith.constant 3.200000e+01 : f32
    %132 = vector.broadcast %cst_50 : f32 to vector<17x1xf32>
    %133 = arith.divf %131, %132 : vector<17x1xf32>
    %134 = vector.broadcast %126 : vector<17x1xf32> to vector<17x32xf32>
    %135 = arith.subf %120, %134 : vector<17x32xf32>
    %cst_51 = arith.constant 9.99999974E-6 : f32
    %136 = vector.broadcast %cst_51 : f32 to vector<17x1xf32>
    %137 = arith.addf %133, %136 : vector<17x1xf32>
    %138 = math.rsqrt %137 : vector<17x1xf32>
    %139 = vector.broadcast %138 : vector<17x1xf32> to vector<17x32xf32>
    %140 = arith.mulf %135, %139 : vector<17x32xf32>
    %141 = vector.broadcast %121 : vector<1x32xf32> to vector<17x32xf32>
    %142 = arith.mulf %140, %141 : vector<17x32xf32>
    %143 = vector.broadcast %122 : vector<1x32xf32> to vector<17x32xf32>
    %144 = arith.addf %142, %143 : vector<17x32xf32>
    %145 = arith.truncf %144 : vector<17x32xf32> to vector<17x32xbf16>
    %c0_52 = arith.constant 0 : index
    %c0_53 = arith.constant 0 : index
    %146 = vector.load %arg10[%c0_52, %c0_53] : memref<32x64xbf16, #tpu.memory_space<vmem>>, vector<32x64xbf16>
    %cst_54 = arith.constant dense<0.000000e+00> : vector<17x64xf32>
    %147 = tpu.matmul %145, %146, %cst_54 {dimension_numbers = #tpu.dot_dimension_numbers<[1], [0], [0], [1], [0, 0, 1, 1], [], []>} : vector<17x32xbf16>, vector<32x64xbf16>, vector<17x64xf32> -> vector<17x64xf32>
    %c0_55 = arith.constant 0 : index
    %c0_56 = arith.constant 0 : index
    %148 = vector.load %arg11[%c0_55, %c0_56] : memref<1x64xf32, #tpu.memory_space<vmem>>, vector<1x64xf32>
    %149 = vector.broadcast %148 : vector<1x64xf32> to vector<17x64xf32>
    %150 = arith.addf %147, %149 : vector<17x64xf32>
    %cst_57 = arith.constant 1.702000e+00 : f32
    %151 = vector.broadcast %cst_57 : f32 to vector<17x64xf32>
    %152 = arith.mulf %151, %150 : vector<17x64xf32>
    %153 = arith.negf %152 : vector<17x64xf32>
    %154 = math.exp %153 : vector<17x64xf32>
    %cst_58 = arith.constant 1.000000e+00 : f32
    %155 = vector.broadcast %cst_58 : f32 to vector<17x64xf32>
    %156 = arith.addf %155, %154 : vector<17x64xf32>
    %157 = arith.divf %155, %156 : vector<17x64xf32>
    %158 = arith.mulf %150, %157 : vector<17x64xf32>
    %159 = arith.truncf %158 : vector<17x64xf32> to vector<17x64xbf16>
    %c0_59 = arith.constant 0 : index
    %c0_60 = arith.constant 0 : index
    %160 = vector.load %arg12[%c0_59, %c0_60] : memref<64x32xbf16, #tpu.memory_space<vmem>>, vector<64x32xbf16>
    %cst_61 = arith.constant dense<0.000000e+00> : vector<17x32xf32>
    %161 = tpu.matmul %159, %160, %cst_61 {dimension_numbers = #tpu.dot_dimension_numbers<[1], [0], [0], [1], [0, 0, 1, 1], [], []>} : vector<17x64xbf16>, vector<64x32xbf16>, vector<17x32xf32> -> vector<17x32xf32>
    %c0_62 = arith.constant 0 : index
    %c0_63 = arith.constant 0 : index
    %162 = vector.load %arg13[%c0_62, %c0_63] : memref<1x32xf32, #tpu.memory_space<vmem>>, vector<1x32xf32>
    %163 = vector.broadcast %162 : vector<1x32xf32> to vector<17x32xf32>
    %164 = arith.addf %161, %163 : vector<17x32xf32>
    %165 = arith.addf %120, %164 : vector<17x32xf32>
    %166 = arith.truncf %165 : vector<17x32xf32> to vector<17x32xbf16>
    %c0_64 = arith.constant 0 : index
    %c0_65 = arith.constant 0 : index
    %c0_66 = arith.constant 0 : index
    %167 = vector.load %arg14[%c0_64, %c0_65, %c0_66] : memref<1x17x32xbf16, #tpu.memory_space<vmem>>, vector<1x17x32xbf16>
    %168 = vector.shape_cast %167 : vector<1x17x32xbf16> to vector<17x32xbf16>
    %169 = vector.shape_cast %166 : vector<17x32xbf16> to vector<1x17x32xbf16>
    tpu.vector_store %arg14[%c0_64, %c0_65, %c0_66], %169 {strides = array<i32>} : memref<1x17x32xbf16, #tpu.memory_space<vmem>>, vector<1x17x32xbf16>,
    return
  }
  func.func @transform_0(%arg0: i32) -> (i32, i32, i32) {
    %c0_i32 = arith.constant 0 : i32
    %c0_i32_0 = arith.constant 0 : i32
    %c0_i32_1 = arith.constant 0 : i32
    return %arg0, %c0_i32, %c0_i32_0 : i32, i32, i32
  }
  func.func @transform_1(%arg0: i32) -> (i32, i32) {
    %c0_i32 = arith.constant 0 : i32
    %c0_i32_0 = arith.constant 0 : i32
    %c0_i32_1 = arith.constant 0 : i32
    return %c0_i32, %c0_i32_0 : i32, i32
  }
  func.func @transform_2(%arg0: i32) -> (i32, i32) {
    %c0_i32 = arith.constant 0 : i32
    %c0_i32_0 = arith.constant 0 : i32
    %c0_i32_1 = arith.constant 0 : i32
    return %c0_i32, %c0_i32_0 : i32, i32
  }
  func.func @transform_3(%arg0: i32) -> (i32, i32) {
    %c0_i32 = arith.constant 0 : i32
    %c0_i32_0 = arith.constant 0 : i32
    %c0_i32_1 = arith.constant 0 : i32
    return %c0_i32, %c0_i32_0 : i32, i32
  }
  func.func @transform_4(%arg0: i32) -> (i32, i32) {
    %c0_i32 = arith.constant 0 : i32
    %c0_i32_0 = arith.constant 0 : i32
    %c0_i32_1 = arith.constant 0 : i32
    return %c0_i32, %c0_i32_0 : i32, i32
  }
  func.func @transform_5(%arg0: i32) -> (i32, i32) {
    %c0_i32 = arith.constant 0 : i32
    %c0_i32_0 = arith.constant 0 : i32
    %c0_i32_1 = arith.constant 0 : i32
    return %c0_i32, %c0_i32_0 : i32, i32
  }
  func.func @transform_6(%arg0: i32) -> (i32, i32) {
    %c0_i32 = arith.constant 0 : i32
    %c0_i32_0 = arith.constant 0 : i32
    %c0_i32_1 = arith.constant 0 : i32
    return %c0_i32, %c0_i32_0 : i32, i32
  }
  func.func @transform_7(%arg0: i32) -> (i32, i32) {
    %c0_i32 = arith.constant 0 : i32
    %c0_i32_0 = arith.constant 0 : i32
    %c0_i32_1 = arith.constant 0 : i32
    return %c0_i32, %c0_i32_0 : i32, i32
  }
  func.func @transform_8(%arg0: i32) -> (i32, i32) {
    %c0_i32 = arith.constant 0 : i32
    %c0_i32_0 = arith.constant 0 : i32
    %c0_i32_1 = arith.constant 0 : i32
    return %c0_i32, %c0_i32_0 : i32, i32
  }
  func.func @transform_9(%arg0: i32) -> (i32, i32) {
    %c0_i32 = arith.constant 0 : i32
    %c0_i32_0 = arith.constant 0 : i32
    %c0_i32_1 = arith.constant 0 : i32
    return %c0_i32, %c0_i32_0 : i32, i32
  }
  func.func @transform_10(%arg0: i32) -> (i32, i32) {
    %c0_i32 = arith.constant 0 : i32
    %c0_i32_0 = arith.constant 0 : i32
    %c0_i32_1 = arith.constant 0 : i32
    return %c0_i32, %c0_i32_0 : i32, i32
  }
  func.func @transform_11(%arg0: i32) -> (i32, i32) {
    %c0_i32 = arith.constant 0 : i32
    %c0_i32_0 = arith.constant 0 : i32
    %c0_i32_1 = arith.constant 0 : i32
    return %c0_i32, %c0_i32_0 : i32, i32
  }
  func.func @transform_12(%arg0: i32) -> (i32, i32) {
    %c0_i32 = arith.constant 0 : i32
    %c0_i32_0 = arith.constant 0 : i32
    %c0_i32_1 = arith.constant 0 : i32
    return %c0_i32, %c0_i32_0 : i32, i32
  }
  func.func @transform_13(%arg0: i32) -> (i32, i32, i32) {
    %c0_i32 = arith.constant 0 : i32
    %c0_i32_0 = arith.constant 0 : i32
    %c0_i32_1 = arith.constant 0 : i32
    return %arg0, %c0_i32, %c0_i32_0 : i32, i32, i32
  }
}

</mosaic_0001>

<bundles_post_ra>
// kernel: mul.15
= control target key start
LH: loop header
LB: loop body
LE: loop exit
PB: predicated region body
PF: predicated region fallthrough
CT: control target
= control target key end

     0   :  { %vm7_vm0 = vcmask 130048   ;;  %s30_s8 = smov 16   ;;  %vm13_vm1 = vcmask 392448   ;;  %vm19_vm2 = vcmask 261248   ;;  %s47_s0 = inlined_call_operand.vmem [shape: f32[3,16], index: 0, kind: input, shape index: {}]   ;;  %s48_s1 = inlined_call_operand.vmem [shape: f32[48], index: 1, kind: output, shape index: {}]  }
   0x1   :  { %v4_v0 = vld [vmem:[%s47_s0] sm:$0xf]  ;;  %s29_s0 = smov 32  }
   0x2   :  { %5 = vst [vmem:[#allocation1] sm:$0xf] %v4_v0 }
   0x9   :  { %v10_v1 = vld [vmem:[#allocation1 + $0x2] sm:$0x1]   ;;  %v6_v2 = vld [vmem:[#allocation1] sm:$0x1]   ;;  %v16_v3 = vld [vmem:[#allocation1 + $0x1] sm:$0x1]  }
   0xa   :  { %11 = vrot.lane.b32.xlu0 %v10_v1, %s29_s0  ;;  %8 = vst.msk [vmem:[#allocation0] sm:$0x1] %vm7_vm0, %v6_v2  }
   0xe   :  { %17 = vrot.lane.b32.xlu0 %v16_v3, %s30_s8 }
  0x7c   :  { %v12_v4 = vpop.permute.xlu0 %11  }
  0x7d   :  { %14 = vst.msk [vmem:[#allocation0] sm:$0x1] %vm13_vm1, %v12_v4  }
  0x80   :  { %v18_v5 = vpop.permute.xlu0 %17  }
  0x81   :  { %20 = vst.msk [vmem:[#allocation0] sm:$0x1] %vm19_vm2, %v18_v5  }
  0x88   :  { %v24_v6 = vld [vmem:[#allocation0] sm:$0x1] }
  0x89   :  { %26 = vst [vmem:[%s48_s1] sm:$0x1] %v24_v6 }

// kernel: neg.0
= control target key start
LH: loop header
LB: loop body
LE: loop exit
PB: predicated region body
PF: predicated region fallthrough
CT: control target
= control target key end

     0   :  { %s24_s0 = inlined_call_operand.vmem [shape: f32[32], index: 0, kind: input, shape index: {}]   ;;  %s25_s1 = inlined_call_operand.vmem [shape: f32[32], index: 1, kind: output, shape index: {}]  }
   0x1   :  { %v2_v0 = vld [vmem:[%s24_s0] sm:$0x1] }
   0x2   :  { %v5_v1 = vxor.u32 2147483648, %v2_v0 }
   0x4   :  { %7 = vst [vmem:[%s25_s1] sm:$0x1] %v5_v1 }

// kernel: reference_encoder2_forward.7
= control target key start
LH: loop header
LB: loop body
LE: loop exit
PB: predicated region body
PF: predicated region fallthrough
CT: control target
= control target key end

     0   :  { %vm19_vm0 = vcmask 254976   ;;  %s137_s0 = inlined_call_operand.vmem [shape: bf16[2,32], index: 0, kind: input, shape index: {}]   ;;  %s138_s1 = inlined_call_operand.vmem [shape: f32[1,32], index: 1, kind: input, shape index: {}]   ;;  %s139_s2 = inlined_call_operand.vmem [shape: f32[1,32], index: 2, kind: input, shape index: {}]   ;;  %s140_s3 = inlined_call_operand.hbm [shape: f32[2,32], index: 3, kind: output, shape index: {}]  }
   0x1   :  { %v15_v0 = vld [vmem:[%s137_s0] sm:$0x1] }
   0x2   :  { %8 = vsyncpa [#allocation3], 0  ;;  %v16_v1 = vunpack.c.l.bf16 %v15_v0  ;;  %v63_v12 = vld [vmem:[%s138_s1] ss:$0 sm:$0xff]  ;;  %s92_s17 = smov [#allocation2]  }
   0x3   :  { %v64_v14 = vld [vmem:[%s139_s2] ss:$0 sm:$0xff]  ;;  %s55_s18 = sshll.u32 %s92_s17, 4  ;;  %s56_s18 = int_to_ptr.vmem [resolvable:$true] %s55_s18 }
   0x4   :  { %v20_v2 = vsel %vm19_vm0, %v16_v1, 0.0  ;;  %s68_s19 = scalar_lea.vmem %s56_s18, 32  ;;  %p73_p1 = scmp.lt.s32.totalorder %s56_s18, %s56_s18 }
   0x5   :  { %21 = vadd.xlane.f32.xlu0 %v20_v2  ;;  %p69_p0 = scmp.ne.s32.totalorder %s56_s18, %s68_s19  ;;  %p74_p2 = scmp.lt.s32.totalorder %s68_s19, %s68_s19 }
   0x7   :  { %p75_p3 = por %p74_p2, %p73_p1 }
   0x9   :  { %p76_p4 = pnand %p75_p3, %p69_p0 }
  0x92   :  { %v22_v3 = vpop.xlane.xlu0 %21 }
  0x93   :  { %v24_v4 = vmul.f32 0.03125, %v22_v3 }
  0x95   :  { %v25_v5 = vsub.f32 %v16_v1, %v24_v4 }
  0x97   :  { %v26_v6 = vmul.f32 %v25_v5, %v25_v5 }
  0x99   :  { %v27_v7 = vsel %vm19_vm0, %v26_v6, 0.0 }
  0x9a   :  { %28 = vadd.xlane.f32.xlu0 %v27_v7 }
 0x127   :  { %v29_v8 = vpop.xlane.xlu0 %28 }
 0x128   :  { %v30_v9 = vmul.f32 0.03125, %v29_v8 }
 0x12a   :  { %v31_v10 = vadd.f32 1e-05, %v30_v9 }
 0x12c   :  { %66 = vrsqrt.f32 %v31_v10 }
 0x136   :  { %v67_v11 = vpop.eup %66 }
 0x137   :  { %v33_v13 = vmul.f32 %v67_v11, %v25_v5 }
 0x139   :  { %v40_v15 = vmul.f32 %v63_v12, %v33_v13 }
 0x13b   :  { %v47_v16 = vadd.f32 %v64_v14, %v40_v15 }
 0x13d   :  { %48 = vst.msk [vmem:[#allocation2] sm:$0x3] %vm19_vm0, %v47_v16 }
 0x13e   :  { %79 = shalt.err (!%p76_p4)
}
 0x13f   :  { %s80_s21 = scalar_lea.hbm %s140_s3, 32 }
 0x140   :  { %p81_p5 = scmp.ne.s32.totalorder %s140_s3, %s80_s21  ;;  %p84_p6 = scmp.lt.u32.totalorder %s80_s21, %s140_s3 }
 0x142   :  { %p86_p7 = pnand %p84_p6, %p81_p5 }
 0x144   :  { %89 = shalt.err (!%p86_p7)
}
 0x145   :  { %58 = dma.vmem_to_hbm [thread:$0]  %s56_s18, 32, %s140_s3, [#allocation3]  }
 0x146   :  { %90 = dma.done.wait [#allocation3], 32  }
 0x147   :  { %91 = vsyncadd [#allocation3], 4294967264 }
 0x148   :  { %62 = vsyncpa [#allocation3], 1 }

// kernel: reference_encoder2_forward.4
= control target key start
LH: loop header
LB: loop body
LE: loop exit
PB: predicated region body
PF: predicated region fallthrough
CT: control target
= control target key end

     0   :  { %s546_s18 = smov 0   ;;  %s598_s0 = inlined_call_operand.vmem [shape: f32[2,17,48], index: 0, kind: input, shape index: {}]   ;;  %s599_s1 = inlined_call_operand.vmem [shape: bf16[48,32], index: 1, kind: input, shape index: {}]   ;;  %s600_s2 = inlined_call_operand.vmem [shape: f32[17,32], index: 2, kind: input, shape index: {}]   ;;  %s601_s3 = inlined_call_operand.vmem [shape: f32[1,32], index: 3, kind: input, shape index: {}]   ;;  %s602_s4 = inlined_call_operand.vmem [shape: f32[1,32], index: 4, kind: input, shape index: {}]   ;;  %s603_s5 = inlined_call_operand.vmem [shape: bf16[2,17,32], index: 5, kind: output, shape index: {}]  }
   0x1 LB: > { %s452_s19 = sadd.s32 4294967295, %s514_s18   ;;  %p456_p0 = scmp.ge.s32.totalorder %s514_s18, 1  ;;  %s514_s18 = sphi %s546_s18, %s15_s18  }
   0x2   : > { %p187_p1 = scmp.lt.s32.totalorder %s514_s18, 3 }
   0x4   : > { %p188_p2 = pnand %p456_p0, %p187_p1 }
   0x5   : > { %v499_v0 = vld [vmem:[%s599_s1] sm:$0xff] (!%p188_p2)   ;;  %p215_p3 = scmp.lt.s32.totalorder (!%p188_p2), %s452_s19, 1  ;;  %v500_v1 = vld [vmem:[%s599_s1 + $0x8] sm:$0xff] (!%p188_p2)   ;;  %v501_v2 = vld [vmem:[%s599_s1 + $0x10] sm:$0xff] (!%p188_p2)   ;;  %vm258_vm0 = vcmask (!%p188_p2), 392192   ;;  %vm322_vm1 = vcmask (!%p188_p2), 253952  }
   0x6   : > { %191 = sbr.rel (%p188_p2) target bundleno = 556 (0x22c), region = 40  ;;  %479 = vmatprep.subr.bf16.mxu0 (!%p188_p2), %v499_v0  ;;  %v239_v8 = vld [vmem:[%s600_s2 + $0x10] sm:$0x1] (!%p188_p2)  ;;  %v237_v10 = vld [vmem:[%s600_s2] sm:$0xff] (!%p188_p2)  ;;  %v238_v13 = vld [vmem:[%s600_s2 + $0x8] sm:$0xff] (!%p188_p2)  ;;  %vm315_vm2 = vcmask (!%p188_p2), 261120  }
   0x7   : > { %480 = vmatpush3.bf16.msra.mxu0 (!%p188_p2), %v499_v0  ;;  %v464_v46 = vld [vmem:[%s601_s3] ss:$0 sm:$0xff] (!%p188_p2)  ;;  %vm392_vm3 = vsmask.f32 (!%p188_p2), 256  ;;  %vm388_vm5 = vcmask (!%p188_p2), 257024  }
   0x8   : > { %481 = vmatprep.subr.bf16.mxu0 (!%p188_p2), %v500_v1  ;;  %v465_v48 = vld [vmem:[%s602_s4] ss:$0 sm:$0xff] (!%p188_p2)  ;;  %vm393_vm4 = vmand (!%p188_p2), %vm322_vm1, %vm392_vm3 }
   0xb   : > { %482 = vmatpush3.bf16.msra.mxu0 (!%p188_p2), %v500_v1 }
   0xc   : > { %483 = vmatprep.subr.bf16.mxu0 (!%p188_p2), %v501_v2 }
   0xd   : > { %s605_s19 = smov (!%p215_p3, %s452_s19), 1 }
   0xe   : > { %s489_s26 = smul.u32 24, %s605_s19 }
   0xf   : > { %484 = vmatpush3.bf16.msra.mxu0 %v501_v2  ;;  %s490_s11 = smul.u32 12, %s605_s19 }
  0x10   : > { %s219_s29 = scalar_lea.vmem %s598_s0, %s489_s26 }
  0x11   : > { %v226_v3 = vld [vmem:[%s219_s29] sm:$0xff]  ;;  %v227_v4 = vld [vmem:[%s219_s29 + $0x8] sm:$0xff]  ;;  %v228_v5 = vld [vmem:[%s219_s29 + $0x10] sm:$0x1]  ;;  %s224_s20 = scalar_lea.vmem %s603_s5, %s490_s11 }
  0x12   : > { %v229_v6 = vpack.c.bf16 %v227_v4, %v226_v3  ;;  %v230_v7 = vpack.c.bf16 %v228_v5, %v228_v5  ;;  %v394_v54 = vld [vmem:[%s224_s20 + $0x8] sm:$0x1] }
  0x14   : > { %485 = vmatprep.mubr.msk.bf16.mxu0 %vm258_vm0, %v229_v6 }
  0x15   : > { %486 = vmatmul.mubr.msk.bf16.vlgmr.msra.gmra.mrb[0].mxu0 %vm258_vm0, %v230_v7 }
  0xe8   : > { %v487_v9 = vpop.f32.mrb[0].mxu0 }
  0xe9   : > { %v308_v11 = vadd.f32 %v487_v9, %v239_v8  ;;  %v299_v12 = vpop.f32.mrb[1].mxu0 }
  0xea   : > { %v488_v14 = vpop.f32.mrb[2].mxu0  ;;  %v300_v15 = vadd.f32 %v299_v12, %v237_v10 }
  0xeb   : > { %v302_v16 = vpop.f32.mrb[3].mxu0  ;;  %v323_v17 = vsel %vm322_vm1, %v308_v11, 0.0 }
  0xec   : > { %v303_v18 = vadd.f32 %v302_v16, %v238_v13  ;;  %324 = vadd.xlane.f32.xlu0 %v323_v17  ;;  %v316_v20 = vsel %vm315_vm2, %v300_v15, 0.0 }
  0xee   : > { %v319_v19 = vsel %vm315_vm2, %v303_v18, 0.0 }
  0xef   : > { %320 = vadd.xlane.f32.xlu1 %v319_v19 }
  0xf0   : > { %317 = vadd.xlane.f32.xlu0 %v316_v20 }
 0x179   : > { %v325_v21 = vpop.xlane.xlu0 %324 }
 0x17a   : > { %v329_v22 = vmul.f32 0.03125, %v325_v21 }
 0x17c   : > { %v332_v23 = vsub.f32 %v308_v11, %v329_v22  ;;  %v321_v24 = vpop.xlane.xlu1 %320 }
 0x17d   : > { %v328_v25 = vmul.f32 0.03125, %v321_v24  ;;  %v318_v26 = vpop.xlane.xlu0 %317 }
 0x17e   : > { %v327_v27 = vmul.f32 0.03125, %v318_v26  ;;  %v335_v28 = vmul.f32 %v332_v23, %v332_v23 }
 0x17f   : > { %v331_v29 = vsub.f32 %v303_v18, %v328_v25 }
 0x180   : > { %v330_v30 = vsub.f32 %v300_v15, %v327_v27  ;;  %v342_v31 = vsel %vm322_vm1, %v335_v28, 0.0 }
 0x181   : > { %343 = vadd.xlane.f32.xlu1 %v342_v31  ;;  %v334_v32 = vmul.f32 %v331_v29, %v331_v29 }
 0x182   : > { %v333_v33 = vmul.f32 %v330_v30, %v330_v30 }
 0x183   : > { %v339_v34 = vsel %vm315_vm2, %v334_v32, 0.0 }
 0x184   : > { %v336_v35 = vsel %vm315_vm2, %v333_v33, 0.0 }
 0x185   : > { %340 = vadd.xlane.f32.xlu1 %v339_v34  ;;  %337 = vadd.xlane.f32.xlu0 %v336_v35 }
 0x20e   : > { %v344_v36 = vpop.xlane.xlu1 %343 }
 0x20f   : > { %v347_v37 = vmul.f32 0.03125, %v344_v36 }
 0x211   : > { %v350_v38 = vadd.f32 1e-05, %v347_v37 }
 0x212   : > { %v341_v39 = vpop.xlane.xlu1 %340  ;;  %v338_v40 = vpop.xlane.xlu0 %337 }
 0x213   : > { %502 = vrsqrt.f32 %v350_v38  ;;  %v346_v41 = vmul.f32 0.03125, %v341_v39  ;;  %v345_v42 = vmul.f32 0.03125, %v338_v40 }
 0x215   : > { %v349_v43 = vadd.f32 1e-05, %v346_v41  ;;  %v348_v44 = vadd.f32 1e-05, %v345_v42 }
 0x217   : > { %504 = vrsqrt.f32 %v349_v43 }
 0x218   : > { %506 = vrsqrt.f32 %v348_v44 }
 0x21d   : > { %v503_v45 = vpop.eup %502 }
 0x21e   : > { %v356_v47 = vmul.f32 %v503_v45, %v332_v23 }
 0x220   : > { %v365_v49 = vmul.f32 %v464_v46, %v356_v47 }
 0x221   : > { %v505_v50 = vpop.eup %504 }
 0x222   : > { %v507_v51 = vpop.eup %506  ;;  %v374_v52 = vadd.f32 %v465_v48, %v365_v49  ;;  %v355_v53 = vmul.f32 %v505_v50, %v331_v29 }
 0x223   : > { %v354_v55 = vmul.f32 %v507_v51, %v330_v30 }
 0x224   : > { %v473_v56 = vpack.c.bf16 %v374_v52, %v374_v52  ;;  %v364_v57 = vmul.f32 %v464_v46, %v355_v53 }
 0x225   : > { %v363_v58 = vmul.f32 %v464_v46, %v354_v55 }
 0x226   : > { %v395_v59 = vsel %vm393_vm4, %v473_v56, %v394_v54  ;;  %v373_v60 = vadd.f32 %v465_v48, %v364_v57 }
 0x227   : > { %396 = vst [vmem:[%s224_s20 + $0x8] sm:$0x1] %v395_v59  ;;  %v372_v61 = vadd.f32 %v465_v48, %v363_v58 }
 0x228   : > { %v472_v62 = vpack.c.bf16 %v373_v60, %v373_v60 }
 0x229   : > { %v471_v63 = vpack.c.bf16 %v372_v61, %v372_v61 }
 0x22a   : > { %390 = vst.msk [vmem:[%s224_s20 + $0x4] sm:$0xf] %vm388_vm5, %v472_v62 }
 0x22b   : > { %389 = vst.msk [vmem:[%s224_s20] sm:$0xf] %vm388_vm5, %v471_v63 }
 0x22c PF: > { %s15_s18 = sadd.s32 1, %s514_s18  }
 0x22d   : > { %p12_p4 = scmp.ge.s32.totalorder %s15_s18, 4  }
 0x22f   :  { %14 = sbr.rel (!%p12_p4) target bundleno = 1 (0x1), region = 70 }

// kernel: reference_encoder2_forward.5
= control target key start
LH: loop header
LB: loop body
LE: loop exit
PB: predicated region body
PF: predicated region fallthrough
CT: control target
= control target key end

     0   :  { %s2154_s25 = smov 0   ;;  %s2430_s0 = inlined_call_operand.vmem [shape: bf16[2,17,32], index: 0, kind: input, shape index: {}, may-alias: {0,13}]   ;;  %s2431_s1 = inlined_call_operand.vmem [shape: f32[1,32], index: 1, kind: input, shape index: {}]   ;;  %s2432_s2 = inlined_call_operand.vmem [shape: f32[1,32], index: 2, kind: input, shape index: {}]   ;;  %s2433_s3 = inlined_call_operand.vmem [shape: bf16[32,96], index: 3, kind: input, shape index: {}]   ;;  %s2434_s4 = inlined_call_operand.vmem [shape: f32[1,96], index: 4, kind: input, shape index: {}]   ;;  %s2435_s5 = inlined_call_operand.vmem [shape: bf16[32,32], index: 5, kind: input, shape index: {}]   ;;  %s2436_s6 = inlined_call_operand.vmem [shape: f32[1,32], index: 6, kind: input, shape index: {}]   ;;  %s2437_s7 = inlined_call_operand.vmem [shape: f32[1,32], index: 7, kind: input, shape index: {}]   ;;  %s2438_s8 = inlined_call_operand.vmem [shape: f32[1,32], index: 8, kind: input, shape index: {}]   ;;  %s2439_s9 = inlined_call_operand.vmem [shape: bf16[32,64], index: 9, kind: input, shape index: {}]   ;;  %s2440_s10 = inlined_call_operand.vmem [shape: f32[1,64], index: 10, kind: input, shape index: {}]   ;;  %s2441_s11 = inlined_call_operand.vmem [shape: bf16[64,32], index: 11, kind: input, shape index: {}]   ;;  %s2442_s12 = inlined_call_operand.vmem [shape: f32[1,32], index: 12, kind: input, shape index: {}]   ;;  %s2443_s13 = inlined_call_operand.vmem [shape: bf16[2,17,32], index: 13, kind: output, shape index: {}, may-alias: {0,13}]  }
   0x1 LB: > { %s1733_s26 = sadd.s32 4294967295, %s2067_s25   ;;  %p1737_p0 = scmp.ge.s32.totalorder %s2067_s25, 1  ;;  %s2067_s25 = sphi %s2154_s25, %s23_s25  }
   0x2   : > { %p387_p1 = scmp.lt.s32.totalorder %s2067_s25, 3 }
   0x4   : > { %p388_p2 = pnand %p1737_p0, %p387_p1 }
   0x5   : > { %p431_p3 = scmp.lt.s32.totalorder (!%p388_p2), %s1733_s26, 1  ;;  %vm450_vm0 = vcmask (!%p388_p2), 261120   ;;  %vm457_vm1 = vcmask (!%p388_p2), 253952   ;;  %v1979_v23 = vld [vmem:[%s2433_s3] sm:$0xff] (!%p388_p2)   ;;  %v1980_v24 = vld [vmem:[%s2433_s3 + $0x8] sm:$0xff] (!%p388_p2)   ;;  %s2069_s24 = smov (!%p388_p2), 96  }
   0x6   : > { %391 = sbr.rel (%p388_p2) target bundleno = 3601 (0xe11), region = 72  ;;  %1847 = vmatprep.subr.bf16.mxu0 (!%p388_p2), %v1979_v23  ;;  %v1740_v36 = vld [vmem:[%s2431_s1] ss:$0 sm:$0xff] (!%p388_p2)  ;;  %vm597_vm2 = vcmask (!%p388_p2), 64512   ;;  %s2070_s28 = smov (!%p388_p2), 64   ;;  %vm665_vm3 = vcmask (!%p388_p2), 131072  }
   0x7   : > { %1848 = vmatpush3.bf16.msra.mxu0 (!%p388_p2), %v1979_v23  ;;  %v1741_v42 = vld [vmem:[%s2432_s2] ss:$0 sm:$0xff] (!%p388_p2)  ;;  %vm658_vm4 = vcmask (!%p388_p2), 138240   ;;  %s2071_s29 = smov (!%p388_p2), 88   ;;  %vm691_vm5 = vcmask (!%p388_p2), 1040384   ;;  %s2074_s14 = smov (!%p388_p2), 56  }
   0x8   : > { %1849 = vmatprep.subr.bf16.mxu0 (!%p388_p2), %v1980_v24  ;;  %v1742_v50 = vld [vmem:[%s2434_s4] ss:$0 sm:$0xff] (!%p388_p2)  ;;  %s2075_s15 = smov (!%p388_p2), 80   ;;  %s2076_s16 = smov (!%p388_p2), 112   ;;  %vm941_vm6 = vcmask (!%p388_p2), 130112   ;;  %vm762_vm7 = vcmask (!%p388_p2), 57344  }
   0x9   : > { %s2077_s17 = smov (!%p388_p2), 48   ;;  %s2078_s18 = smov (!%p388_p2), 72   ;;  %vm944_vm8 = vcmask (!%p388_p2), 122944   ;;  %vm1123_vm9 = vcmask (!%p388_p2), 195712   ;;  %vm1126_vm10 = vcmask (!%p388_p2), 188544   ;;  %vm1305_vm11 = vcmask (!%p388_p2), 261312  }
   0xa   : > { %s2079_s19 = smov (!%p388_p2), 104   ;;  %s2080_s20 = smov (!%p388_p2), 40   ;;  %vm1308_vm12 = vcmask (!%p388_p2), 254144   ;;  %vm1598_vm13 = vcmask (!%p388_p2), 523264   ;;  %vm1673_vm14 = vsmask.f32 (!%p388_p2), 256 }
   0xb   : > { %1850 = vmatpush3.bf16.msra.mxu0 (!%p388_p2), %v1980_v24  ;;  %s2081_s21 = smov (!%p388_p2), 8   ;;  %s2082_s22 = smov (!%p388_p2), 16   ;;  %vm1674_vm15 = vmand (!%p388_p2), %vm457_vm1, %vm1673_vm14 }
   0xd   : > { %s2445_s26 = smov (!%p431_p3, %s1733_s26), 1 }
   0xe   : > { %s1955_s27 = smul.u32 12, %s2445_s26 }
  0x10   : > { %s435_s30 = scalar_lea.vmem %s2430_s0, %s1955_s27 }
  0x11   : > { %v1794_v0 = vld [vmem:[%s435_s30] sm:$0xff]   ;;  %v444_v1 = vld [vmem:[%s435_s30 + $0x8] sm:$0x1]  ;;  %s2072_s30 = smov 120  }
  0x12   : > { %v2170_v2 = vunpack.c.l.bf16 %v1794_v0  ;;  %v2172_v3 = vunpack.c.l.bf16 %v444_v1  ;;  %v2174_v4 = vunpack.c.h.bf16 %v1794_v0 }
  0x14   : > { %v451_v5 = vsel %vm450_vm0, %v2170_v2, 0.0  ;;  %v458_v6 = vsel %vm457_vm1, %v2172_v3, 0.0  ;;  %v454_v7 = vsel %vm450_vm0, %v2174_v4, 0.0 }
  0x15   : > { %452 = vadd.xlane.f32.xlu0 %v451_v5  ;;  %459 = vadd.xlane.f32.xlu1 %v458_v6 }
  0x19   : > { %455 = vadd.xlane.f32.xlu0 %v454_v7 }
  0xa2   : > { %v453_v8 = vpop.xlane.xlu0 %452  ;;  %v460_v9 = vpop.xlane.xlu1 %459 }
  0xa3   : > { %v462_v10 = vmul.f32 0.03125, %v453_v8  ;;  %v464_v11 = vmul.f32 0.03125, %v460_v9 }
  0xa5   : > { %v465_v12 = vsub.f32 %v2170_v2, %v462_v10  ;;  %v467_v13 = vsub.f32 %v2172_v3, %v464_v11 }
  0xa6   : > { %v456_v14 = vpop.xlane.xlu0 %455 }
  0xa7   : > { %v463_v15 = vmul.f32 0.03125, %v456_v14  ;;  %v468_v16 = vmul.f32 %v465_v12, %v465_v12  ;;  %v470_v17 = vmul.f32 %v467_v13, %v467_v13 }
  0xa9   : > { %v466_v18 = vsub.f32 %v2174_v4, %v463_v15  ;;  %v471_v19 = vsel %vm450_vm0, %v468_v16, 0.0  ;;  %v477_v20 = vsel %vm457_vm1, %v470_v17, 0.0 }
  0xaa   : > { %472 = vadd.xlane.f32.xlu1 %v471_v19  ;;  %v2073_v19 = vmov 0  }
  0xab   : > { %v469_v21 = vmul.f32 %v466_v18, %v466_v18 }
  0xad   : > { %v474_v22 = vsel %vm450_vm0, %v469_v21, 0.0 }
  0xae   : > { %478 = vadd.xlane.f32.xlu1 %v477_v20  ;;  %475 = vadd.xlane.f32.xlu0 %v474_v22  ;;  %v2230_v20 = vsel %vm691_vm5, 65535, %v2073_v19 }
 0x137   : > { %v473_v25 = vpop.xlane.xlu1 %472 }
 0x138   : > { %v480_v26 = vmul.f32 0.03125, %v473_v25 }
 0x13a   : > { %v483_v27 = vadd.f32 1e-05, %v480_v26 }
 0x13b   : > { %v479_v28 = vpop.xlane.xlu1 %478  ;;  %v476_v29 = vpop.xlane.xlu0 %475 }
 0x13c   : > { %1989 = vrsqrt.f32 %v483_v27  ;;  %v482_v30 = vmul.f32 0.03125, %v479_v28  ;;  %v481_v31 = vmul.f32 0.03125, %v476_v29 }
 0x13e   : > { %v485_v32 = vadd.f32 1e-05, %v482_v30  ;;  %v484_v33 = vadd.f32 1e-05, %v481_v31 }
 0x140   : > { %1991 = vrsqrt.f32 %v485_v32 }
 0x141   : > { %1993 = vrsqrt.f32 %v484_v33 }
 0x146   : > { %v1990_v34 = vpop.eup %1989 }
 0x147   : > { %v489_v35 = vmul.f32 %v1990_v34, %v465_v12 }
 0x149   : > { %v498_v41 = vmul.f32 %v1740_v36, %v489_v35 }
 0x14a   : > { %v1992_v37 = vpop.eup %1991 }
 0x14b   : > { %v1994_v38 = vpop.eup %1993  ;;  %v491_v39 = vmul.f32 %v1992_v37, %v467_v13  ;;  %v507_v46 = vadd.f32 %v1741_v42, %v498_v41 }
 0x14c   : > { %v490_v40 = vmul.f32 %v1994_v38, %v466_v18 }
 0x14d   : > { %v500_v43 = vmul.f32 %v1740_v36, %v491_v39 }
 0x14e   : > { %v499_v44 = vmul.f32 %v1740_v36, %v490_v40 }
 0x14f   : > { %v509_v45 = vadd.f32 %v1741_v42, %v500_v43 }
 0x150   : > { %v508_v47 = vadd.f32 %v1741_v42, %v499_v44 }
 0x151   : > { %v511_v48 = vpack.c.bf16 %v509_v45, %v509_v45 }
 0x152   : > { %v510_v49 = vpack.c.bf16 %v508_v47, %v507_v46 }
 0x154   : > { %1851 = vmatprep.mubr.msk.bf16.mxu0 %vm450_vm0, %v510_v49 }
 0x155   : > { %1852 = vmatmul.mubr.msk.bf16.vlgmr.msra.gmra.mrb[0].mxu0 %vm450_vm0, %v511_v48 }
 0x228   : > { %v1853_v51 = vpop.f32.mrb[0].mxu0 }
 0x229   : > { %v584_v52 = vadd.f32 %v1853_v51, %v1742_v50  ;;  %v575_v53 = vpop.f32.mrb[1].mxu0 }
 0x22a   : > { %v1854_v54 = vpop.f32.mrb[2].mxu0  ;;  %v576_v57 = vadd.f32 %v1742_v50, %v575_v53 }
 0x22b   : > { %v2205_v55 = vpack.c.bf16 %v584_v52, %v584_v52  ;;  %v578_v56 = vpop.f32.mrb[3].mxu0 }
 0x22c   : > { %v579_v58 = vadd.f32 %v1742_v50, %v578_v56 }
 0x22d   : > { %595 = vrot.lane.b32.xlu1 %v2205_v55, %s2069_s24 }
 0x22e   : > { %v2208_v59 = vpack.c.bf16 %v579_v58, %v576_v57 }
 0x230   : > { %593 = vrot.lane.b32.xlu0 %v2208_v59, %s2069_s24  ;;  %1859 = vmatprep.mubr.msk.bf16.mxu1 %vm597_vm2, %v2208_v59  ;;  %s440_s24 = scalar_lea.vmem %s2443_s13, %s1955_s27 }
 0x231   : > { %680 = vrot.lane.b32.xlu1 %v2208_v59, %s2070_s28 }
 0x29f   : > { %v596_v60 = vpop.permute.xlu1 %595 }
 0x2a0   : > { %v608_v0 = vsel %vm597_vm2, %v596_v60, 0 }
 0x2a2   : > { %v594_v61 = vpop.permute.xlu0 %593 }
 0x2a3   : > { %v681_v62 = vpop.permute.xlu1 %680  ;;  %1947 = vmatprep.subr.msk.bf16.mxu1 %vm597_vm2, %v594_v61  ;;  %v605_v63 = vsel %vm597_vm2, %v594_v61, 0 }
 0x2a4   : > { %1856 = vmatpush3.bf16.xpose.msra.mxu1 %v605_v63  ;;  %1863 = vmatprep.subr.bf16.mxu0 %v681_v62 }
 0x2a5   : > { %1948 = vmatprep.subr.msk.bf16.mxu1 %vm597_vm2, %v596_v60  ;;  %1864 = vmatpush3.bf16.msra.mxu0 %v681_v62 }
 0x2ac   : > { %1858 = vmatpush3.bf16.xpose.msra.mxu1 %v608_v0 }
 0x2b3   : > { %1860 = vmatmul.mubr.msk.bf16.vlgmr.msra.gmra.mrb[0].mxu1 %vm597_vm2, %v2205_v55 }
 0x386   : > { %v1861_v1 = vpop.f32.mrb[0].mxu1 }
 0x387   : > { %v644_v5 = vpop.f32.mrb[1].mxu1  ;;  %v666_v6 = vsel %vm665_vm3, %v1861_v1, -inf }
 0x388   : > { %667 = vmax.xlane.f32.xlu0 %v666_v6  ;;  %v1862_v7 = vpop.f32.mrb[2].mxu1  ;;  %v659_v8 = vsel %vm658_vm4, %v644_v5, -inf }
 0x389   : > { %660 = vmax.xlane.f32.xlu1 %v659_v8  ;;  %v647_v9 = vpop.f32.mrb[3].mxu1 }
 0x38a   : > { %v662_v10 = vsel %vm658_vm4, %v647_v9, -inf }
 0x38c   : > { %663 = vmax.xlane.f32.xlu0 %v662_v10 }
 0x39a   : > { %768 = vrot.lane.b32.xlu1 %v2208_v59, %s2071_s29 }
 0x39e   : > { %770 = vrot.lane.b32.xlu1 %v2205_v55, %s2071_s29 }
 0x3a2   : > { %764 = vrot.lane.b32.xlu1 %v2208_v59, %s2072_s30  ;;  %682 = vrot.lane.b32.xlu0 %v2205_v55, %s2070_s28 }
 0x3a6   : > { %766 = vrot.lane.b32.xlu0 %v2205_v55, %s2072_s30  ;;  %s2083_s30 = smov 24  }
 0x415   : > { %v668_v11 = vpop.xlane.xlu0 %667 }
 0x416   : > { %v671_v12 = vsub.f32 %v1861_v1, %v668_v11  ;;  %v661_v13 = vpop.xlane.xlu1 %660 }
 0x417   : > { %v669_v14 = vsub.f32 %v644_v5, %v661_v13 }
 0x418   : > { %v676_v15 = vmul.f32 1.442695, %v671_v12 }
 0x419   : > { %v672_v16 = vmul.f32 1.442695, %v669_v14  ;;  %v664_v17 = vpop.xlane.xlu0 %663 }
 0x41a   : > { %v670_v18 = vsub.f32 %v647_v9, %v664_v17  ;;  %1995 = vpow2.f32 %v676_v15  ;;  %v769_v24 = vpop.permute.xlu1 %768 }
 0x41b   : > { %1997 = vpow2.f32 %v672_v16  ;;  %v779_v31 = vsel %vm597_vm2, %v769_v24, 0 }
 0x41c   : > { %v674_v21 = vmul.f32 1.442695, %v670_v18 }
 0x41d   : > { %v683_v22 = vpop.permute.xlu0 %682 }
 0x41e   : > { %1999 = vpow2.f32 %v674_v21  ;;  %v695_v23 = vand.u32 %v2230_v20, %v683_v22  ;;  %v771_v26 = vpop.permute.xlu1 %770 }
 0x41f   : > { %v782_v33 = vsel %vm597_vm2, %v771_v26, 0 }
 0x420   : > { %1865 = vmatprep.subr.bf16.mxu0 %v695_v23 }
 0x421   : > { %1866 = vmatpush3.bf16.msra.mxu0 %v695_v23  ;;  %v767_v34 = vpop.permute.xlu0 %766 }
 0x422   : > { %1949 = vmatprep.subr.msk.bf16.mxu0 %vm597_vm2, %v769_v24  ;;  %v765_v32 = vpop.permute.xlu1 %764 }
 0x424   : > { %v2234_v25 = vpop.eup %1995 }
 0x425   : > { %v2236_v27 = vpop.eup %1997  ;;  %v679_v30 = vpack.c.bf16 %v2234_v25, %v2234_v25 }
 0x428   : > { %v2238_v28 = vpop.eup %1999 }
 0x429   : > { %v678_v29 = vpack.c.bf16 %v2238_v28, %v2236_v27 }
 0x42b   : > { %1867 = vmatprep.mubr.msk.bf16.mxu0 %vm658_vm4, %v678_v29 }
 0x42c   : > { %1868 = vmatmul.mubr.msk.bf16.vlgmr.msra.gmra.mrb[4].mxu0 %vm658_vm4, %v679_v30 }
 0x42d   : > { %1872 = vmatpush3.bf16.xpose.msra.mxu0 %v779_v31  ;;  %1875 = vmatprep.mubr.msk.bf16.mxu0 %vm597_vm2, %v765_v32 }
 0x42e   : > { %1950 = vmatprep.subr.msk.bf16.mxu0 %vm597_vm2, %v771_v26 }
 0x435   : > { %1874 = vmatpush3.bf16.xpose.msra.mxu0 %v782_v33 }
 0x43c   : > { %1876 = vmatmul.mubr.msk.bf16.vlgmr.msra.gmra.mrb[8].mxu0 %vm597_vm2, %v767_v34 }
 0x4ff   : > { %v2251_v35 = vpop.f32.mrb[4].mxu0 }
 0x500   : > { %v2253_v36 = vpop.f32.mrb[5].mxu0 }
 0x501   : > { %v1870_v37 = vpop.f32.mrb[6].mxu0 }
 0x502   : > { %v2255_v38 = vpop.f32.mrb[7].mxu0 }
 0x50f   : > { %v1877_v39 = vpop.f32.mrb[8].mxu0 }
 0x510   : > { %v818_v40 = vpop.f32.mrb[9].mxu0  ;;  %v838_v41 = vsel %vm665_vm3, %v1877_v39, -inf }
 0x511   : > { %839 = vmax.xlane.f32.xlu0 %v838_v41  ;;  %v1878_v42 = vpop.f32.mrb[10].mxu0  ;;  %v832_v43 = vsel %vm658_vm4, %v818_v40, -inf }
 0x512   : > { %833 = vmax.xlane.f32.xlu1 %v832_v43  ;;  %v821_v44 = vpop.f32.mrb[11].mxu0 }
 0x513   : > { %v835_v45 = vsel %vm658_vm4, %v821_v44, -inf }
 0x515   : > { %836 = vmax.xlane.f32.xlu0 %v835_v45 }
 0x523   : > { %854 = vrot.lane.b32.xlu1 %v2205_v55, %s2074_s14 }
 0x527   : > { %950 = vrot.lane.b32.xlu1 %v2208_v59, %s2075_s15 }
 0x52b   : > { %952 = vrot.lane.b32.xlu1 %v2205_v55, %s2075_s15  ;;  %852 = vrot.lane.b32.xlu0 %v2208_v59, %s2074_s14 }
 0x52f   : > { %948 = vrot.lane.b32.xlu1 %v2205_v55, %s2076_s16  ;;  %946 = vrot.lane.b32.xlu0 %v2208_v59, %s2076_s16 }
 0x533   : > { %1036 = vrot.lane.b32.xlu1 %v2205_v55, %s2077_s17 }
 0x59e   : > { %v840_v46 = vpop.xlane.xlu0 %839 }
 0x59f   : > { %v843_v47 = vsub.f32 %v1877_v39, %v840_v46  ;;  %v834_v48 = vpop.xlane.xlu1 %833 }
 0x5a0   : > { %v841_v49 = vsub.f32 %v818_v40, %v834_v48 }
 0x5a1   : > { %v848_v50 = vmul.f32 1.442695, %v843_v47 }
 0x5a2   : > { %v844_v51 = vmul.f32 1.442695, %v841_v49  ;;  %v837_v52 = vpop.xlane.xlu0 %836 }
 0x5a3   : > { %v842_v53 = vsub.f32 %v821_v44, %v837_v52  ;;  %v855_v54 = vpop.permute.xlu1 %854  ;;  %2001 = vpow2.f32 %v848_v50 }
 0x5a4   : > { %2003 = vpow2.f32 %v844_v51  ;;  %v864_v58 = vand.u32 %v855_v54, %v2230_v20 }
 0x5a5   : > { %v846_v56 = vmul.f32 1.442695, %v842_v53 }
 0x5a6   : > { %v853_v57 = vpop.permute.xlu0 %852 }
 0x5a7   : > { %2005 = vpow2.f32 %v846_v56  ;;  %1879 = vmatprep.subr.bf16.mxu1 %v853_v57  ;;  %v951_v60 = vpop.permute.xlu1 %950 }
 0x5a8   : > { %1880 = vmatpush3.bf16.msra.mxu1 %v853_v57  ;;  %v961_v5 = vsel %vm597_vm2, %v951_v60, 0 }
 0x5a9   : > { %1881 = vmatprep.subr.bf16.mxu1 %v864_v58 }
 0x5aa   : > { %v947_v6 = vpop.permute.xlu0 %946 }
 0x5ab   : > { %v953_v7 = vpop.permute.xlu1 %952 }
 0x5ac   : > { %1882 = vmatpush3.bf16.msra.mxu1 %v864_v58  ;;  %v964_v8 = vsel %vm597_vm2, %v953_v7, 0 }
 0x5ad   : > { %1951 = vmatprep.subr.msk.bf16.mxu1 %vm597_vm2, %v951_v60  ;;  %v2270_v61 = vpop.eup %2001 }
 0x5ae   : > { %v2272_v62 = vpop.eup %2003  ;;  %v851_v1 = vpack.c.bf16 %v2270_v61, %v2270_v61 }
 0x5af   : > { %v949_v9 = vpop.permute.xlu1 %948 }
 0x5b1   : > { %v2274_v63 = vpop.eup %2005 }
 0x5b2   : > { %v850_v0 = vpack.c.bf16 %v2274_v63, %v2272_v62 }
 0x5b3   : > { %v1037_v22 = vpop.permute.xlu1 %1036 }
 0x5b4   : > { %1883 = vmatprep.mubr.msk.bf16.mxu1 %vm658_vm4, %v850_v0  ;;  %v1046_v39 = vand.u32 %v1037_v22, %v2230_v20 }
 0x5b5   : > { %1884 = vmatmul.mubr.msk.bf16.vlgmr.msra.gmra.mrb[4].mxu1 %vm658_vm4, %v851_v1 }
 0x5b6   : > { %1888 = vmatpush3.bf16.xpose.msra.mxu1 %v961_v5  ;;  %1891 = vmatprep.mubr.msk.bf16.mxu1 %vm597_vm2, %v947_v6  ;;  %v914_v6 = vsel %vm658_vm4, %v2272_v62, 0.0 }
 0x5b7   : > { %1952 = vmatprep.subr.msk.bf16.mxu1 %vm597_vm2, %v953_v7  ;;  %v917_v7 = vsel %vm658_vm4, %v2274_v63, 0.0 }
 0x5be   : > { %1890 = vmatpush3.bf16.xpose.msra.mxu1 %v964_v8 }
 0x5c5   : > { %1892 = vmatmul.mubr.msk.bf16.vlgmr.msra.gmra.mrb[8].mxu1 %vm597_vm2, %v949_v9  ;;  %v920_v9 = vsel %vm665_vm3, %v2270_v61, 0.0 }
 0x688   : > { %v2287_v10 = vpop.f32.mrb[4].mxu1 }
 0x689   : > { %v2289_v11 = vpop.f32.mrb[5].mxu1 }
 0x68a   : > { %v1886_v12 = vpop.f32.mrb[6].mxu1 }
 0x68b   : > { %v2291_v13 = vpop.f32.mrb[7].mxu1 }
 0x698   : > { %v1893_v14 = vpop.f32.mrb[8].mxu1 }
 0x699   : > { %v1000_v15 = vpop.f32.mrb[9].mxu1  ;;  %v1020_v16 = vsel %vm665_vm3, %v1893_v14, -inf }
 0x69a   : > { %1021 = vmax.xlane.f32.xlu0 %v1020_v16  ;;  %v1894_v17 = vpop.f32.mrb[10].mxu1  ;;  %v1014_v21 = vsel %vm658_vm4, %v1000_v15, -inf }
 0x69b   : > { %v1003_v18 = vpop.f32.mrb[11].mxu1 }
 0x69c   : > { %v1017_v19 = vsel %vm658_vm4, %v1003_v18, -inf }
 0x69d   : > { %1018 = vmax.xlane.f32.xlu1 %v1017_v19 }
 0x69e   : > { %1015 = vmax.xlane.f32.xlu0 %v1014_v21 }
 0x6ae   : > { %1132 = vrot.lane.b32.xlu1 %v2208_v59, %s2078_s18 }
 0x6b2   : > { %1128 = vrot.lane.b32.xlu1 %v2208_v59, %s2079_s19 }
 0x6b4   : > { %1034 = vrot.lane.b32.xlu0 %v2208_v59, %s2077_s17 }
 0x6b8   : > { %1134 = vrot.lane.b32.xlu0 %v2205_v55, %s2078_s18 }
 0x6bc   : > { %1130 = vrot.lane.b32.xlu0 %v2205_v55, %s2079_s19 }
 0x727   : > { %v1022_v23 = vpop.xlane.xlu0 %1021 }
 0x728   : > { %v1025_v24 = vsub.f32 %v1893_v14, %v1022_v23 }
 0x72a   : > { %v1030_v26 = vmul.f32 1.442695, %v1025_v24  ;;  %v1019_v29 = vpop.xlane.xlu1 %1018 }
 0x72b   : > { %v1024_v30 = vsub.f32 %v1003_v18, %v1019_v29  ;;  %v1016_v31 = vpop.xlane.xlu0 %1015 }
 0x72c   : > { %v1023_v32 = vsub.f32 %v1000_v15, %v1016_v31  ;;  %2007 = vpow2.f32 %v1030_v26 }
 0x72d   : > { %v1028_v33 = vmul.f32 1.442695, %v1024_v30 }
 0x72e   : > { %v1026_v34 = vmul.f32 1.442695, %v1023_v32  ;;  %v1133_v40 = vpop.permute.xlu1 %1132 }
 0x72f   : > { %2009 = vpow2.f32 %v1028_v33  ;;  %v1035_v37 = vpop.permute.xlu0 %1034  ;;  %v1143_v46 = vsel %vm597_vm2, %v1133_v40, 0 }
 0x730   : > { %2011 = vpow2.f32 %v1026_v34  ;;  %1895 = vmatprep.subr.bf16.mxu0 %v1035_v37  ;;  %v748_v34 = vsel %vm658_vm4, %v2238_v28, 0.0 }
 0x731   : > { %1896 = vmatpush3.bf16.msra.mxu0 %v1035_v37  ;;  %v751_v37 = vsel %vm665_vm3, %v2234_v25, 0.0 }
 0x732   : > { %1897 = vmatprep.subr.bf16.mxu0 %v1046_v39  ;;  %v1129_v47 = vpop.permute.xlu1 %1128 }
 0x733   : > { %v1135_v48 = vpop.permute.xlu0 %1134 }
 0x734   : > { %v1146_v49 = vsel %vm597_vm2, %v1135_v48, 0 }
 0x735   : > { %1898 = vmatpush3.bf16.msra.mxu0 %v1046_v39 }
 0x736   : > { %1953 = vmatprep.subr.msk.bf16.mxu0 %vm597_vm2, %v1133_v40  ;;  %v2008_v41 = vpop.eup %2007 }
 0x737   : > { %v1033_v45 = vpack.c.bf16 %v2008_v41, %v2008_v41  ;;  %v1131_v50 = vpop.permute.xlu0 %1130  ;;  %v1102_v12 = vsel %vm665_vm3, %v2008_v41, 0.0 }
 0x739   : > { %v2010_v42 = vpop.eup %2009 }
 0x73a   : > { %v2012_v43 = vpop.eup %2011 }
 0x73b   : > { %v1032_v44 = vpack.c.bf16 %v2010_v42, %v2012_v43  ;;  %v1096_v8 = vsel %vm658_vm4, %v2012_v43, 0.0 }
 0x73d   : > { %1899 = vmatprep.mubr.msk.bf16.mxu0 %vm658_vm4, %v1032_v44 }
 0x73e   : > { %1900 = vmatmul.mubr.msk.bf16.vlgmr.msra.gmra.mrb[12].mxu0 %vm658_vm4, %v1033_v45 }
 0x73f   : > { %1904 = vmatpush3.bf16.xpose.msra.mxu0 %v1143_v46  ;;  %1907 = vmatprep.mubr.msk.bf16.mxu0 %vm597_vm2, %v1129_v47 }
 0x740   : > { %1954 = vmatprep.subr.msk.bf16.mxu0 %vm597_vm2, %v1135_v48 }
 0x747   : > { %1906 = vmatpush3.bf16.xpose.msra.mxu0 %v1146_v49 }
 0x74e   : > { %1908 = vmatmul.mubr.msk.bf16.vlgmr.msra.gmra.mrb[16].mxu0 %vm597_vm2, %v1131_v50 }
 0x811   : > { %v2311_v51 = vpop.f32.mrb[12].mxu0 }
 0x812   : > { %v2313_v52 = vpop.f32.mrb[13].mxu0 }
 0x813   : > { %v1902_v53 = vpop.f32.mrb[14].mxu0 }
 0x814   : > { %v2315_v54 = vpop.f32.mrb[15].mxu0 }
 0x821   : > { %v1909_v56 = vpop.f32.mrb[16].mxu0 }
 0x822   : > { %v1182_v57 = vpop.f32.mrb[17].mxu0  ;;  %v1202_v58 = vsel %vm665_vm3, %v1909_v56, -inf }
 0x823   : > { %1203 = vmax.xlane.f32.xlu0 %v1202_v58  ;;  %v1910_v60 = vpop.f32.mrb[18].mxu0  ;;  %v1196_v0 = vsel %vm658_vm4, %v1182_v57, -inf }
 0x824   : > { %1197 = vmax.xlane.f32.xlu1 %v1196_v0  ;;  %v1185_v1 = vpop.f32.mrb[19].mxu0 }
 0x825   : > { %v1199_v5 = vsel %vm658_vm4, %v1185_v1, -inf }
 0x827   : > { %1200 = vmax.xlane.f32.xlu0 %v1199_v5 }
 0x835   : > { %1218 = vrot.lane.b32.xlu1 %v2205_v55, %s2080_s20  ;;  %v1099_v55 = vsel %vm658_vm4, %v2010_v42, 0.0 }
 0x83d   : > { %1216 = vrot.lane.b32.xlu0 %v2208_v59, %s2080_s20 }
 0x859   : > { %915 = vadd.xlane.f32.xlu1 %v914_v6 }
 0x85c   : > { %918 = vadd.xlane.f32.xlu0 %v917_v7 }
 0x85d   : > { %1097 = vadd.xlane.f32.xlu1 %v1096_v8 }
 0x860   : > { %921 = vadd.xlane.f32.xlu0 %v920_v9 }
 0x861   : > { %1103 = vadd.xlane.f32.xlu1 %v1102_v12 }
 0x864   : > { %1100 = vadd.xlane.f32.xlu0 %v1099_v55  ;;  %v1982_v55 = vld [vmem:[%s2435_s5 + $0x8] sm:$0xff]  }
 0x8b0   : > { %v1204_v59 = vpop.xlane.xlu0 %1203 }
 0x8b1   : > { %v1207_v62 = vsub.f32 %v1909_v56, %v1204_v59  ;;  %v1198_v14 = vpop.xlane.xlu1 %1197 }
 0x8b2   : > { %v1205_v15 = vsub.f32 %v1182_v57, %v1198_v14 }
 0x8b3   : > { %v1212_v16 = vmul.f32 1.442695, %v1207_v62 }
 0x8b4   : > { %v1208_v63 = vmul.f32 1.442695, %v1205_v15  ;;  %v1201_v17 = vpop.xlane.xlu0 %1200 }
 0x8b5   : > { %v1206_v18 = vsub.f32 %v1185_v1, %v1201_v17  ;;  %v1219_v19 = vpop.permute.xlu1 %1218 }
 0x8b6   : > { %2013 = vpow2.f32 %v1208_v63  ;;  %v1228_v22 = vand.u32 %v1219_v19, %v2230_v20  ;;  %v745_v20 = vsel %vm658_vm4, %v2236_v27, 0.0 }
 0x8b7   : > { %v1210_v21 = vmul.f32 1.442695, %v1206_v18  ;;  %2015 = vpow2.f32 %v1212_v16 }
 0x8b8   : > { %v1217_v61 = vpop.permute.xlu0 %1216 }
 0x8b9   : > { %2017 = vpow2.f32 %v1210_v21  ;;  %1911 = vmatprep.subr.bf16.mxu1 %v1217_v61 }
 0x8ba   : > { %1912 = vmatpush3.bf16.msra.mxu1 %v1217_v61 }
 0x8bb   : > { %1913 = vmatprep.subr.bf16.mxu1 %v1228_v22 }
 0x8be   : > { %1914 = vmatpush3.bf16.msra.mxu1 %v1228_v22 }
 0x8c0   : > { %v2014_v23 = vpop.eup %2013 }
 0x8c1   : > { %v1278_v24 = vsel %vm658_vm4, %v2014_v23, 0.0  ;;  %v2016_v26 = vpop.eup %2015 }
 0x8c2   : > { %1279 = vadd.xlane.f32.xlu0 %v1278_v24  ;;  %v1284_v32 = vsel %vm665_vm3, %v2016_v26, 0.0  ;;  %v1215_v33 = vpack.c.bf16 %v2016_v26, %v2016_v26 }
 0x8c3   : > { %v2018_v29 = vpop.eup %2017 }
 0x8c4   : > { %v1281_v30 = vsel %vm658_vm4, %v2018_v29, 0.0  ;;  %v1214_v31 = vpack.c.bf16 %v2018_v29, %v2014_v23 }
 0x8c5   : > { %1282 = vadd.xlane.f32.xlu1 %v1281_v30 }
 0x8c6   : > { %1285 = vadd.xlane.f32.xlu0 %v1284_v32  ;;  %1915 = vmatprep.mubr.msk.bf16.mxu1 %vm658_vm4, %v1214_v31  ;;  %v1763_v32 = vld [vmem:[%s2436_s6] ss:$0 sm:$0xff] }
 0x8c7   : > { %1916 = vmatmul.mubr.msk.bf16.vlgmr.msra.gmra.mrb[12].mxu1 %vm658_vm4, %v1215_v33 }
 0x8c9   : > { %746 = vadd.xlane.f32.xlu1 %v745_v20 }
 0x8ca   : > { %749 = vadd.xlane.f32.xlu0 %v748_v34 }
 0x8cd   : > { %752 = vadd.xlane.f32.xlu1 %v751_v37 }
 0x8e6   : > { %v916_v39 = vpop.xlane.xlu1 %915 }
 0x8e7   : > { %2019 = vrcp.f32 %v916_v39 }
 0x8e9   : > { %v919_v40 = vpop.xlane.xlu0 %918 }
 0x8ea   : > { %2021 = vrcp.f32 %v919_v40  ;;  %v1098_v41 = vpop.xlane.xlu1 %1097 }
 0x8ed   : > { %v922_v42 = vpop.xlane.xlu0 %921 }
 0x8ee   : > { %2023 = vrcp.f32 %v922_v42  ;;  %v1104_v44 = vpop.xlane.xlu1 %1103 }
 0x8ef   : > { %2025 = vrcp.f32 %v1098_v41 }
 0x8f1   : > { %v2020_v43 = vpop.eup %2019  ;;  %v1101_v27 = vpop.xlane.xlu0 %1100 }
 0x8f2   : > { %2027 = vrcp.f32 %v1101_v27  ;;  %v926_v45 = vmul.f32 %v2020_v43, %v2289_v11 }
 0x8f3   : > { %2029 = vrcp.f32 %v1104_v44 }
 0x8f4   : > { %v2022_v28 = vpop.eup %2021  ;;  %932 = vrot.lane.b32.xlu0 %v926_v45, %s2081_s21 }
 0x8f5   : > { %v927_v25 = vmul.f32 %v2022_v28, %v2291_v13 }
 0x8f7   : > { %934 = vrot.lane.b32.xlu1 %v927_v25, %s2081_s21 }
 0x8f8   : > { %v2024_v46 = vpop.eup %2023 }
 0x8f9   : > { %v928_v47 = vmul.f32 %v2024_v46, %v2287_v10  ;;  %v2026_v48 = vpop.eup %2025 }
 0x8fa   : > { %v1108_v50 = vmul.f32 %v2026_v48, %v2313_v52 }
 0x8fb   : > { %936 = vrot.lane.b32.xlu1 %v928_v47, %s2081_s21 }
 0x8fc   : > { %v2028_v49 = vpop.eup %2027 }
 0x8fd   : > { %v1109_v53 = vmul.f32 %v2028_v49, %v2315_v54  ;;  %v2030_v56 = vpop.eup %2029 }
 0x8fe   : > { %v1110_v11 = vmul.f32 %v2030_v56, %v2311_v51 }
 0x8ff   : > { %1114 = vrot.lane.b32.xlu1 %v1108_v50, %s2082_s22  ;;  %1116 = vrot.lane.b32.xlu0 %v1109_v53, %s2082_s22 }
 0x903   : > { %1118 = vrot.lane.b32.xlu1 %v1110_v11, %s2082_s22 }
 0x94f   : > { %v1280_v57 = vpop.xlane.xlu0 %1279 }
 0x952   : > { %v1283_v13 = vpop.xlane.xlu1 %1282 }
 0x953   : > { %v1286_v58 = vpop.xlane.xlu0 %1285 }
 0x956   : > { %v747_v60 = vpop.xlane.xlu1 %746 }
 0x957   : > { %2031 = vrcp.f32 %v747_v60  ;;  %v750_v10 = vpop.xlane.xlu0 %749  ;;  %v1983_v60 = vld [vmem:[%s2439_s9] sm:$0xff]  }
 0x958   : > { %2033 = vrcp.f32 %v750_v10  ;;  %1927 = vmatprep.subr.bf16.mxu0 %v1983_v60  ;;  %v1984_v10 = vld [vmem:[%s2439_s9 + $0x8] sm:$0xff]  }
 0x959   : > { %1928 = vmatpush3.bf16.msra.mxu0 %v1983_v60 }
 0x95a   : > { %v753_v0 = vpop.xlane.xlu1 %752  ;;  %1929 = vmatprep.subr.bf16.mxu0 %v1984_v10 }
 0x95b   : > { %2035 = vrcp.f32 %v753_v0 }
 0x95c   : > { %2037 = vrcp.f32 %v1286_v58 }
 0x95d   : > { %2039 = vrcp.f32 %v1280_v57  ;;  %1930 = vmatpush3.bf16.msra.mxu0 %v1984_v10 }
 0x95e   : > { %2041 = vrcp.f32 %v1283_v13 }
 0x961   : > { %v2032_v1 = vpop.eup %2031 }
 0x962   : > { %v2034_v52 = vpop.eup %2033  ;;  %v757_v54 = vmul.f32 %v2032_v1, %v2253_v36 }
 0x963   : > { %v758_v5 = vmul.f32 %v2034_v52, %v2255_v38 }
 0x964   : > { %760 = vst.msk [vmem:[#allocation2] sm:$0xff] %vm597_vm2, %v757_v54 }
 0x965   : > { %v2036_v51 = vpop.eup %2035  ;;  %761 = vst.msk [vmem:[#allocation2 + $0x8] sm:$0xff] %vm597_vm2, %v758_v5 }
 0x966   : > { %v933_v6 = vpop.permute.xlu0 %932  ;;  %v759_v7 = vmul.f32 %v2036_v51, %v2251_v35  ;;  %v1981_v35 = vld [vmem:[%s2435_s5] sm:$0xff]   ;;  %v2038_v59 = vpop.eup %2037 }
 0x967   : > { %942 = vst.msk [vmem:[#allocation2] sm:$0xff] %vm941_vm6, %v933_v6  ;;  %1919 = vmatprep.subr.bf16.mxu1 %v1981_v35  ;;  %v2040_v14 = vpop.eup %2039 }
 0x968   : > { %763 = vst.msk [vmem:[#allocation2 + $0x10] sm:$0x1] %vm762_vm7, %v759_v7  ;;  %1920 = vmatpush3.bf16.msra.mxu1 %v1981_v35  ;;  %v2042_v18 = vpop.eup %2041 }
 0x969   : > { %v935_v8 = vpop.permute.xlu1 %934  ;;  %1921 = vmatprep.subr.bf16.mxu1 %v1982_v55 }
 0x96a   : > { %943 = vst.msk [vmem:[#allocation2 + $0x8] sm:$0xff] %vm941_vm6, %v935_v8 }
 0x96c   : > { %1922 = vmatpush3.bf16.msra.mxu1 %v1982_v55 }
 0x96d   : > { %v937_v9 = vpop.permute.xlu1 %936 }
 0x96e   : > { %945 = vst.msk [vmem:[#allocation2 + $0x10] sm:$0x1] %vm944_vm8, %v937_v9 }
 0x971   : > { %v1115_v36 = vpop.permute.xlu1 %1114  ;;  %v1117_v38 = vpop.permute.xlu0 %1116 }
 0x972   : > { %1124 = vst.msk [vmem:[#allocation2] sm:$0xff] %vm1123_vm9, %v1115_v36  ;;  %1125 = vst.msk [vmem:[#allocation2 + $0x8] sm:$0xff] %vm1123_vm9, %v1117_v38  ;;  %v1768_v36 = vld [vmem:[%s2437_s7] ss:$0 sm:$0xff] }
 0x975   : > { %v1119_v12 = vpop.permute.xlu1 %1118 }
 0x976   : > { %1127 = vst.msk [vmem:[#allocation2 + $0x10] sm:$0x1] %vm1126_vm10, %v1119_v12 }
 0x99a   : > { %v1917_v62 = vpop.f32.mrb[12].mxu1 }
 0x99b   : > { %v1292_v15 = vmul.f32 %v2038_v59, %v1917_v62  ;;  %v1264_v16 = vpop.f32.mrb[13].mxu1  ;;  %v1769_v59 = vld [vmem:[%s2438_s8] ss:$0 sm:$0xff] }
 0x99c   : > { %v1290_v63 = vmul.f32 %v2040_v14, %v1264_v16  ;;  %v1918_v17 = vpop.f32.mrb[14].mxu1 }
 0x99d   : > { %v1267_v19 = vpop.f32.mrb[15].mxu1 }
 0x99e   : > { %v1291_v21 = vmul.f32 %v2042_v18, %v1267_v19  ;;  %1296 = vrot.lane.b32.xlu0 %v1290_v63, %s2083_s30 }
 0x9a0   : > { %1298 = vrot.lane.b32.xlu1 %v1291_v21, %s2083_s30 }
 0x9a2   : > { %1300 = vrot.lane.b32.xlu0 %v1292_v15, %s2083_s30 }
 0xa10   : > { %v1297_v61 = vpop.permute.xlu0 %1296 }
 0xa11   : > { %1306 = vst.msk [vmem:[#allocation2] sm:$0xff] %vm1305_vm11, %v1297_v61  ;;  %v1985_v61 = vld [vmem:[%s2441_s11] sm:$0xff]  }
 0xa12   : > { %v1299_v22 = vpop.permute.xlu1 %1298  ;;  %1935 = vmatprep.subr.bf16.mxu1 %v1985_v61 }
 0xa13   : > { %1307 = vst.msk [vmem:[#allocation2 + $0x8] sm:$0xff] %vm1305_vm11, %v1299_v22  ;;  %v1986_v22 = vld [vmem:[%s2441_s11 + $0x8] sm:$0xff]  }
 0xa14   : > { %v1301_v23 = vpop.permute.xlu0 %1300 }
 0xa15   : > { %1309 = vst.msk [vmem:[#allocation2 + $0x10] sm:$0x1] %vm1308_vm12, %v1301_v23  ;;  %v1987_v23 = vld [vmem:[%s2441_s11 + $0x10] sm:$0xff]  }
 0xa18   : > { %v1310_v24 = vld [vmem:[#allocation2] sm:$0xff] }
 0xa1a   : > { %v1311_v26 = vld [vmem:[#allocation2 + $0x8] sm:$0xff] }
 0xa1b   : > { %v1313_v29 = vpack.c.bf16 %v1311_v26, %v1310_v24  ;;  %v1988_v24 = vld [vmem:[%s2441_s11 + $0x18] sm:$0xff]   ;;  %v1770_v26 = vld [vmem:[%s2440_s10] ss:$0 sm:$0xff] }
 0xa1c   : > { %v1312_v30 = vld [vmem:[#allocation2 + $0x10] sm:$0x1] }
 0xa1d   : > { %1923 = vmatprep.mubr.msk.bf16.mxu1 %vm450_vm0, %v1313_v29  ;;  %v1314_v31 = vpack.c.bf16 %v1312_v30, %v1312_v30 }
 0xa1f   : > { %1924 = vmatmul.mubr.msk.bf16.vlgmr.msra.gmra.mrb[16].mxu1 %vm450_vm0, %v1314_v31 }
 0xa20   : > { %1936 = vmatpush3.bf16.msra.mxu1 %v1985_v61 }
 0xa21   : > { %1937 = vmatprep.subr.bf16.mxu1 %v1986_v22 }
 0xa24   : > { %1938 = vmatpush3.bf16.msra.mxu1 %v1986_v22 }
 0xa25   : > { %1939 = vmatprep.subr.bf16.mxu1 %v1987_v23 }
 0xa28   : > { %1940 = vmatpush3.bf16.msra.mxu1 %v1987_v23 }
 0xa29   : > { %1941 = vmatprep.subr.bf16.mxu1 %v1988_v24 }
 0xa2c   : > { %1942 = vmatpush3.bf16.msra.mxu1 %v1988_v24 }
 0xaf2   : > { %v1925_v33 = vpop.f32.mrb[16].mxu1 }
 0xaf3   : > { %v1378_v20 = vpop.f32.mrb[17].mxu1  ;;  %v1387_v40 = vadd.f32 %v1925_v33, %v1763_v32 }
 0xaf4   : > { %v1379_v34 = vadd.f32 %v1763_v32, %v1378_v20  ;;  %v1926_v37 = vpop.f32.mrb[18].mxu1 }
 0xaf5   : > { %v1381_v39 = vpop.f32.mrb[19].mxu1  ;;  %v2374_v27 = vadd.f32 %v1387_v40, %v2172_v3 }
 0xaf6   : > { %v2366_v41 = vadd.f32 %v2170_v2, %v1379_v34  ;;  %v1382_v42 = vadd.f32 %v1763_v32, %v1381_v39 }
 0xaf7   : > { %v1403_v28 = vsel %vm457_vm1, %v2374_v27, 0.0 }
 0xaf8   : > { %v2369_v43 = vadd.f32 %v2174_v4, %v1382_v42  ;;  %v1397_v44 = vsel %vm450_vm0, %v2366_v41, 0.0 }
 0xaf9   : > { %1398 = vadd.xlane.f32.xlu1 %v1397_v44 }
 0xafa   : > { %v1400_v45 = vsel %vm450_vm0, %v2369_v43, 0.0 }
 0xafb   : > { %1401 = vadd.xlane.f32.xlu0 %v1400_v45 }
 0xaff   : > { %1404 = vadd.xlane.f32.xlu0 %v1403_v28 }
 0xb86   : > { %v1399_v2 = vpop.xlane.xlu1 %1398 }
 0xb87   : > { %v1406_v25 = vmul.f32 0.03125, %v1399_v2 }
 0xb88   : > { %v1402_v46 = vpop.xlane.xlu0 %1401 }
 0xb89   : > { %v1409_v4 = vsub.f32 %v2366_v41, %v1406_v25  ;;  %v1407_v47 = vmul.f32 0.03125, %v1402_v46 }
 0xb8b   : > { %v1410_v48 = vsub.f32 %v2369_v43, %v1407_v47  ;;  %v1412_v49 = vmul.f32 %v1409_v4, %v1409_v4 }
 0xb8c   : > { %v1405_v50 = vpop.xlane.xlu0 %1404 }
 0xb8d   : > { %v1408_v3 = vmul.f32 0.03125, %v1405_v50  ;;  %v1415_v53 = vsel %vm450_vm0, %v1412_v49, 0.0  ;;  %v1413_v56 = vmul.f32 %v1410_v48, %v1410_v48 }
 0xb8e   : > { %1416 = vadd.xlane.f32.xlu0 %v1415_v53 }
 0xb8f   : > { %v1411_v11 = vsub.f32 %v2374_v27, %v1408_v3  ;;  %v1418_v57 = vsel %vm450_vm0, %v1413_v56, 0.0 }
 0xb90   : > { %1419 = vadd.xlane.f32.xlu1 %v1418_v57 }
 0xb91   : > { %v1414_v13 = vmul.f32 %v1411_v11, %v1411_v11 }
 0xb93   : > { %v1421_v58 = vsel %vm457_vm1, %v1414_v13, 0.0  ;;  %v1778_v13 = vld [vmem:[%s2442_s12] ss:$0 sm:$0xff] }
 0xb94   : > { %1422 = vadd.xlane.f32.xlu0 %v1421_v58 }
 0xc1b   : > { %v1417_v0 = vpop.xlane.xlu0 %1416 }
 0xc1c   : > { %v1424_v1 = vmul.f32 0.03125, %v1417_v0 }
 0xc1d   : > { %v1420_v52 = vpop.xlane.xlu1 %1419 }
 0xc1e   : > { %v1427_v54 = vadd.f32 1e-05, %v1424_v1  ;;  %v1425_v5 = vmul.f32 0.03125, %v1420_v52 }
 0xc20   : > { %2043 = vrsqrt.f32 %v1427_v54  ;;  %v1428_v51 = vadd.f32 1e-05, %v1425_v5  ;;  %v1675_v5 = vld [vmem:[%s440_s24 + $0x8] sm:$0x1] }
 0xc21   : > { %v1423_v6 = vpop.xlane.xlu0 %1422 }
 0xc22   : > { %2045 = vrsqrt.f32 %v1428_v51  ;;  %v1426_v7 = vmul.f32 0.03125, %v1423_v6 }
 0xc24   : > { %v1429_v8 = vadd.f32 1e-05, %v1426_v7 }
 0xc26   : > { %2047 = vrsqrt.f32 %v1429_v8 }
 0xc2a   : > { %v2044_v9 = vpop.eup %2043 }
 0xc2b   : > { %v1433_v38 = vmul.f32 %v2044_v9, %v1409_v4 }
 0xc2c   : > { %v2046_v12 = vpop.eup %2045 }
 0xc2d   : > { %v1434_v35 = vmul.f32 %v2046_v12, %v1410_v48  ;;  %v1442_v55 = vmul.f32 %v1768_v36, %v1433_v38 }
 0xc2f   : > { %v1443_v62 = vmul.f32 %v1768_v36, %v1434_v35  ;;  %v1451_v16 = vadd.f32 %v1769_v59, %v1442_v55 }
 0xc30   : > { %v2048_v14 = vpop.eup %2047 }
 0xc31   : > { %v1435_v15 = vmul.f32 %v2048_v14, %v1411_v11  ;;  %v1452_v63 = vadd.f32 %v1769_v59, %v1443_v62 }
 0xc33   : > { %v1444_v17 = vmul.f32 %v1768_v36, %v1435_v15  ;;  %v1454_v18 = vpack.c.bf16 %v1452_v63, %v1451_v16 }
 0xc35   : > { %1931 = vmatprep.mubr.msk.bf16.mxu0 %vm450_vm0, %v1454_v18  ;;  %v1453_v19 = vadd.f32 %v1769_v59, %v1444_v17 }
 0xc37   : > { %v1455_v21 = vpack.c.bf16 %v1453_v19, %v1453_v19 }
 0xc39   : > { %1932 = vmatmul.mubr.msk.bf16.vlgmr.msra.gmra.mrb[20].mxu0 %vm450_vm0, %v1455_v21  ;;  %vm1669_vm0 = vcmask 257024  }
 0xd0c   : > { %v1933_v29 = vpop.f32.mrb[20].mxu0 }
 0xd0d   : > { %v1528_v30 = vadd.f32 %v1933_v29, %v1770_v26  ;;  %v1519_v31 = vpop.f32.mrb[21].mxu0 }
 0xd0e   : > { %v1520_v32 = vadd.f32 %v1770_v26, %v1519_v31  ;;  %v1934_v33 = vpop.f32.mrb[22].mxu0 }
 0xd0f   : > { %v1777_v20 = vmul.f32 -1.702, %v1528_v30  ;;  %v1522_v34 = vpop.f32.mrb[23].mxu0 }
 0xd10   : > { %v1775_v37 = vmul.f32 -1.702, %v1520_v32  ;;  %v1523_v39 = vadd.f32 %v1770_v26, %v1522_v34 }
 0xd11   : > { %v1543_v40 = vmul.f32 1.442695, %v1777_v20 }
 0xd12   : > { %v1539_v42 = vmul.f32 1.442695, %v1775_v37  ;;  %v1776_v44 = vmul.f32 -1.702, %v1523_v39 }
 0xd13   : > { %2049 = vpow2.f32 %v1543_v40 }
 0xd14   : > { %2051 = vpow2.f32 %v1539_v42  ;;  %v1541_v45 = vmul.f32 1.442695, %v1776_v44 }
 0xd16   : > { %2053 = vpow2.f32 %v1541_v45 }
 0xd1d   : > { %v2050_v28 = vpop.eup %2049 }
 0xd1e   : > { %v2052_v2 = vpop.eup %2051  ;;  %v1547_v25 = vadd.f32 1.0, %v2050_v28 }
 0xd1f   : > { %v1545_v46 = vadd.f32 1.0, %v2052_v2 }
 0xd20   : > { %v2054_v4 = vpop.eup %2053  ;;  %2055 = vrcp.f32 %v1547_v25 }
 0xd21   : > { %2057 = vrcp.f32 %v1545_v46  ;;  %v1546_v47 = vadd.f32 1.0, %v2054_v4 }
 0xd23   : > { %2059 = vrcp.f32 %v1546_v47 }
 0xd2a   : > { %v2056_v48 = vpop.eup %2055 }
 0xd2b   : > { %v2058_v49 = vpop.eup %2057  ;;  %v1556_v3 = vmul.f32 %v2056_v48, %v1528_v30 }
 0xd2c   : > { %v1554_v53 = vmul.f32 %v2058_v49, %v1520_v32 }
 0xd2d   : > { %v2060_v50 = vpop.eup %2059  ;;  %v1558_v57 = vpack.c.bf16 %v1556_v3, %v1556_v3 }
 0xd2e   : > { %v1555_v56 = vmul.f32 %v2060_v50, %v1523_v39 }
 0xd30   : > { %v1557_v11 = vpack.c.bf16 %v1555_v56, %v1554_v53 }
 0xd32   : > { %1943 = vmatprep.mubr.msk.bf16.mxu1 %vm1598_vm13, %v1557_v11 }
 0xd33   : > { %1944 = vmatmul.mubr.msk.bf16.vlgmr.msra.gmra.mrb[20].mxu1 %vm1598_vm13, %v1558_v57 }
 0xe06   : > { %v1945_v58 = vpop.f32.mrb[20].mxu1 }
 0xe07   : > { %v1648_v60 = vadd.f32 %v1945_v58, %v1778_v13  ;;  %v1639_v10 = vpop.f32.mrb[21].mxu1 }
 0xe08   : > { %v1640_v0 = vadd.f32 %v1778_v13, %v1639_v10  ;;  %v1946_v1 = vpop.f32.mrb[22].mxu1 }
 0xe09   : > { %v1655_v52 = vadd.f32 %v1648_v60, %v2374_v27  ;;  %v1642_v54 = vpop.f32.mrb[23].mxu1 }
 0xe0a   : > { %v1653_v51 = vadd.f32 %v1640_v0, %v2366_v41  ;;  %v1643_v6 = vadd.f32 %v1778_v13, %v1642_v54 }
 0xe0b   : > { %v1792_v7 = vpack.c.bf16 %v1655_v52, %v1655_v52 }
 0xe0c   : > { %v1790_v8 = vpack.c.bf16 %v1653_v51, %v1653_v51  ;;  %v1654_v9 = vadd.f32 %v1643_v6, %v2369_v43 }
 0xe0d   : > { %v1676_v36 = vsel %vm1674_vm15, %v1792_v7, %v1675_v5 }
 0xe0e   : > { %1677 = vst [vmem:[%s440_s24 + $0x8] sm:$0x1] %v1676_v36  ;;  %1670 = vst.msk [vmem:[%s440_s24] sm:$0xf] %vm1669_vm0, %v1790_v8  ;;  %v1791_v38 = vpack.c.bf16 %v1654_v9, %v1654_v9 }
 0xe10   : > { %1671 = vst.msk [vmem:[%s440_s24 + $0x4] sm:$0xf] %vm1669_vm0, %v1791_v38 }
 0xe11 PF: > { %s23_s25 = sadd.s32 1, %s2067_s25  }
 0xe12   : > { %p20_p4 = scmp.ge.s32.totalorder %s23_s25, 4  }
 0xe14   :  { %22 = sbr.rel (!%p20_p4) target bundleno = 1 (0x1), region = 102 }

</bundles_post_ra>
